<compile_context>
chip_gen: v5e
topology: v5e:2x2
jax: 0.10.0
libtpu: 0.0.40
codegen_flags: <defaults>
</compile_context>

<pallas_src>
import functools

import jax
import jax.numpy as jnp
from jax import lax
from jax.experimental import pallas as pl
from jax.experimental.pallas import tpu as pltpu

LEAKY_SLOPE = 0.01   # nn.LeakyReLU default
GN_EPS = 1e-5        # nn.GroupNorm default


def _leaky_relu(x):
    # one mul + max instead of cmp + mul + select (valid since LEAKY_SLOPE < 1)
    return jnp.maximum(x, LEAKY_SLOPE * x)


def basic_block_kernel(x_ref, wb1_ref, b1_ref, g1_ref, be1_ref,
                       wb2_ref, b2_ref, g2_ref, be2_ref, pg_ref,
                       o_ref, *, mxu_dtype):
    """One batch tile per grid step; everything lane-dense (B, H, WC).

    x_ref  : (B, H, WC)      lane-dense input tile (WC = W*C)
    wb*_ref: (3*WC, WC)      banded conv weights (dx taps + width zero-padding folded in)
    b*/g*/be*_ref : (1, WC)  conv bias / GN gamma / GN beta, tiled over W
    pg_ref : (WC, WC)        GroupNorm group-pooling matrix (includes 1/count), f32
    o_ref  : (B, H, WC)      lane-dense output tile
    """
    B, H, WC = x_ref.shape
    R = B * H

    x = x_ref[...]                                          # (B, H, WC) f32

    # Image-boundary masks for the height halo: hoisted once, reused by both convs.
    # (H, 1) bool broadcasts over the batch (leading) and lane dims.
    row = lax.broadcasted_iota(jnp.int32, (H, 1), 0)
    top_row = row == 0
    bot_row = row == H - 1

    def shift_rows(t):
        # t[:, h-1] / t[:, h+1] with zero rows at image boundaries.  Roll on the merged
        # (B*H, WC) view; rows that wrap across batch boundaries are exactly the
        # boundary rows that get masked to zero, so the merge is safe.
        t2 = t.reshape(R, WC)
        up = pltpu.roll(t2, shift=1, axis=0).reshape(B, H, WC)
        down = pltpu.roll(t2, shift=R - 1, axis=0).reshape(B, H, WC)
        up = jnp.where(top_row, 0.0, up)
        down = jnp.where(bot_row, 0.0, down)
        return up, down

    def conv3x3(t, wb_ref, bias_row):
        # One MXU matmul per conv: M = B*H, K = 3*WC, N = WC (lane-dense output).
        # Inputs/weights may be bf16 (v6e/v7x); accumulation stays f32.
        up, down = shift_rows(t)
        rows = jnp.concatenate([up, t, down], axis=-1).reshape(R, 3 * WC)
        y = jnp.dot(rows.astype(mxu_dtype), wb_ref[...],
                    preferred_element_type=jnp.float32)      # (R, WC) f32
        return y.reshape(B, H, WC) + bias_row                # (1, WC) broadcasts

    def group_norm(y, gamma_row, beta_row):
        # Per-sample group stats via one f32 pooling matmul each; two-pass variance
        # (GroupNorm statistics are cancellation-sensitive, so this path stays f32).
        pg = pg_ref[...]
        mean = jnp.dot(jnp.sum(y, axis=1), pg,
                       preferred_element_type=jnp.float32)   # (B, WC)
        centered = y - mean[:, None, :]
        var = jnp.dot(jnp.sum(centered * centered, axis=1), pg,
                      preferred_element_type=jnp.float32)    # (B, WC)
        # Fold gamma into the rsqrt before broadcasting to (B, H, WC).
        scale = lax.rsqrt(var + GN_EPS) * gamma_row          # (B, WC)
        return centered * scale[:, None, :] + beta_row

    # conv1 -> GroupNorm -> LeakyReLU
    y = conv3x3(x, wb1_ref, b1_ref[...])
    y = _leaky_relu(group_norm(y, g1_ref[...], be1_ref[...]))

    # conv2 -> GroupNorm (no activation)
    y = conv3x3(y, wb2_ref, b2_ref[...])
    y = group_norm(y, g2_ref[...], be2_ref[...])

    # identity branch (stride == 1 -> nn.Identity) + final activation; full-lane store
    o_ref[...] = _leaky_relu(x + y)


def _banded_conv_matrix(w_hwio, W, dtype):
    """(3, 3, Cin, Cout) HWIO -> (3*W*Cin, W*Cout) block-tridiagonal matrix, stacked
    over dy, so each 3x3 'same' conv row is one matmul on lane-dense rows."""
    mats = []
    for dy in range(3):
        m = 0.0
        for dx in range(3):
            # eye(W, k=1-dx)[w_in, w_out] == 1  iff  w_in == w_out + dx - 1
            m = m + jnp.kron(jnp.eye(W, k=1 - dx, dtype=jnp.float32), w_hwio[dy, dx])
        mats.append(m)
    return jnp.concatenate(mats, axis=0).astype(dtype)


def _default_mxu_dtype():
    # bf16 at the MXU on bf16-native chips (v6e / v7x); f32 elsewhere (v5e and older:
    # typically memory-bound at small C and the bf16 cast costs VPU cycles there).
    try:
        kind = jax.devices()[0].device_kind.lower()
    except Exception:
        return jnp.float32
    return jnp.bfloat16 if ("v6" in kind or "v7" in kind) else jnp.float32


def _pick_b_tile(N, H, WC, *, target_rows=512, min_grid=2, max_tile_bytes=4 << 20):
    """Largest-useful batch tile: conv matmul M = b_tile*H aims for >= target_rows,
    grid = N // b_tile kept >= min_grid when possible (v7x megacore split), and the
    activation tile is bounded by a VMEM byte budget.
    NOTE: only divisors of N are considered; an odd/prime N degrades to b_tile=1
    (perf cliff, not a bug) — pad the batch upstream for such sizes."""
    divs = [d for d in range(1, N + 1) if N % d == 0]
    fits = [d for d in divs if d * H * WC * 4 <= max_tile_bytes] or [1]
    cands = [d for d in fits if (N // d) >= min_grid] or fits
    big = [d for d in cands if d * H >= target_rows]
    return min(big) if big else max(cands)


def basic_block_pallas_lane_dense(x_ld, params, *, channels, groups,
                                  b_tile=None, mxu_dtype=None):
    """BasicBlock on lane-dense (N, H, W*C) f32 activations.

    Inside a stack of blocks, call this directly and keep activations in the lane-dense
    layout between blocks; do the NCHW <-> lane-dense transposes once at the network
    boundary (each wrapper transpose is an extra full HBM sweep on a memory-bound block).
    """
    N, H, WC = x_ld.shape
    C = channels
    assert WC % C == 0
    W = WC // C
    assert C % groups == 0
    cpg = C // groups

    # stride=1 / dilation=1 / Cin==Cout only (identity residual branch is nn.Identity).
    # TODO(synk): stride>1 / Cin!=Cout downsample branch (3x3-conv identity) not implemented.
    assert params["w1"].shape == (3, 3, C, C) and params["w2"].shape == (3, 3, C, C), (
        "only stride=1, dilation=1, Cin==Cout BasicBlock supported")

    if mxu_dtype is None:
        mxu_dtype = _default_mxu_dtype()

    # Weight / pooling constants.  The banded matrix is O((W*C)^2); keep its footprint
    # honest against v7x's 64 MiB VMEM before scaling W*C.
    w_itemsize = jnp.dtype(mxu_dtype).itemsize
    const_bytes = 2 * 3 * WC * WC * w_itemsize + WC * WC * 4
    assert const_bytes <= (24 << 20), (
        "banded conv weights + GN pooling matrix too large for VMEM; "
        "switch to the width-tiled / im2col variant")

    wb1 = _banded_conv_matrix(params["w1"], W, mxu_dtype)
    wb2 = _banded_conv_matrix(params["w2"], W, mxu_dtype)

    # GroupNorm pooling matrix over lane-dense (w, c) positions (includes 1/count); f32.
    gid = (jnp.arange(WC) % C) // cpg
    pg = (gid[:, None] == gid[None, :]).astype(jnp.float32) / float(H * W * cpg)

    tile_row = lambda v: jnp.tile(v.astype(jnp.float32), W).reshape(1, WC)

    if b_tile is None:
        b_tile = _pick_b_tile(N, H, WC)
    assert N % b_tile == 0, "batch must be divisible by b_tile (pad N for odd/prime batches)"

    # VMEM budget: in/out activation tiles (double-buffered) + constants (double-buffered
    # invariants) + headroom for in-kernel temporaries (rows, halos, centered, ...).
    tile_bytes = b_tile * H * WC * 4
    est = 4 * tile_bytes + 2 * const_bytes + 12 * tile_bytes
    vmem_limit = min(64 << 20, max(32 << 20, 2 * est))   # <= v7x physical VMEM

    kernel = functools.partial(basic_block_kernel, mxu_dtype=mxu_dtype)
    full = lambda shape: pl.BlockSpec(shape, lambda n: (0,) * len(shape))

    out_ld = pl.pallas_call(
        kernel,
        out_shape=jax.ShapeDtypeStruct((N, H, WC), jnp.float32),
        grid=(N // b_tile,),
        in_specs=[
            pl.BlockSpec((b_tile, H, WC), lambda n: (n, 0, 0)),
            full((3 * WC, WC)), full((1, WC)), full((1, WC)), full((1, WC)),
            full((3 * WC, WC)), full((1, WC)), full((1, WC)), full((1, WC)),
            full((WC, WC)),
        ],
        out_specs=pl.BlockSpec((b_tile, H, WC), lambda n: (n, 0, 0)),
        compiler_params=pltpu.CompilerParams(
            dimension_semantics=("parallel",),    # batch tiles independent (v7x 2xTC)
            vmem_limit_bytes=int(vmem_limit)),
    )(x_ld,
      wb1, tile_row(params["b1"]), tile_row(params["g1"]), tile_row(params["be1"]),
      wb2, tile_row(params["b2"]), tile_row(params["g2"]), tile_row(params["be2"]),
      pg)
    return out_ld


def basic_block_pallas(x_nchw, params, *, groups, b_tile=None, mxu_dtype=None):
    """NCHW convenience wrapper.  For stacks of blocks, prefer the lane-dense entry point
    and convert layouts once at the network boundary."""
    N, C, H, W = x_nchw.shape
    x_ld = jnp.transpose(x_nchw, (0, 2, 3, 1)).astype(jnp.float32).reshape(N, H, W * C)
    out_ld = basic_block_pallas_lane_dense(x_ld, params, channels=C, groups=groups,
                                           b_tile=b_tile, mxu_dtype=mxu_dtype)
    return jnp.transpose(out_ld.reshape(N, H, W, C), (0, 3, 1, 2))   # back to NCHW


# ---------------- pure-JAX reference (for correctness check) ----------------
def basic_block_ref(x_nchw, params, *, groups):
    x = jnp.transpose(x_nchw, (0, 2, 3, 1)).astype(jnp.float32)   # NHWC

    def conv(y, w, b):
        out = lax.conv_general_dilated(
            y, w, window_strides=(1, 1), padding="SAME",
            dimension_numbers=("NHWC", "HWIO", "NHWC"))
        return out + b[None, None, None, :]

    def gn(y, gamma, beta):
        n, h, w, c = y.shape
        yg = y.reshape(n, h, w, groups, c // groups)
        mean = yg.mean(axis=(1, 2, 4), keepdims=True)
        var = ((yg - mean) ** 2).mean(axis=(1, 2, 4), keepdims=True)
        yn = ((yg - mean) * lax.rsqrt(var + GN_EPS)).reshape(n, h, w, c)
        return yn * gamma[None, None, None, :] + beta[None, None, None, :]

    r = _leaky_relu(gn(conv(x, params["w1"], params["b1"]),
                       params["g1"], params["be1"]))
    r = gn(conv(r, params["w2"], params["b2"]), params["g2"], params["be2"])
    out = _leaky_relu(x + r)
    return jnp.transpose(out, (0, 3, 1, 2))


if __name__ == "__main__":
    # in_channels == out_channels == 8, stride=1; W*C = 128 (lane-dense);
    # N=8 -> auto b_tile=4, grid=2 (both TensorCores busy on v7x, M = 64 rows/step here;
    # the same selection logic yields M >= 512 once the batch is large enough).
    N, C, H, W = 8, 8, 16, 16
    GROUPS = 4

    key = jax.random.PRNGKey(0)
    ks = jax.random.split(key, 10)
    params = {
        "w1": 0.1 * jax.random.normal(ks[0], (3, 3, C, C), jnp.float32),
        "b1": 0.1 * jax.random.normal(ks[1], (C,), jnp.float32),
        "g1": 1.0 + 0.1 * jax.random.normal(ks[2], (C,), jnp.float32),
        "be1": 0.1 * jax.random.normal(ks[3], (C,), jnp.float32),
        "w2": 0.1 * jax.random.normal(ks[4], (3, 3, C, C), jnp.float32),
        "b2": 0.1 * jax.random.normal(ks[5], (C,), jnp.float32),
        "g2": 1.0 + 0.1 * jax.random.normal(ks[6], (C,), jnp.float32),
        "be2": 0.1 * jax.random.normal(ks[7], (C,), jnp.float32),
    }
    x = jax.random.normal(ks[8], (N, C, H, W), jnp.float32)

    ref = jax.block_until_ready(basic_block_ref(x, params, groups=GROUPS))

    # f32-at-the-MXU path: tight tolerance.
    out_f32 = jax.block_until_ready(
        basic_block_pallas(x, params, groups=GROUPS, mxu_dtype=jnp.float32))
    assert out_f32.shape == (N, C, H, W)
    assert jnp.max(jnp.abs(out_f32 - ref)) < 1e-4, "f32 Pallas output mismatch vs reference"

    # bf16-at-the-MXU path (v6e/v7x default): f32 accumulation + f32 GroupNorm stats,
    # only the conv-matmul inputs/weights are bf16 -> loose absolute tolerance.
    out_bf16 = jax.block_until_ready(
        basic_block_pallas(x, params, groups=GROUPS, mxu_dtype=jnp.bfloat16))
    assert jnp.max(jnp.abs(out_bf16 - ref)) < 1e-1, "bf16 Pallas output mismatch vs reference"

    print("KERNEL_OK")
</pallas_src>

<mosaic_0001>
module attributes {stable_mosaic.version = 11 : i64} {
  func.func @basic_block_kernel(%arg0: i32, %arg1: memref<4x16x128xf32, #tpu.memory_space<vmem>>, %arg2: memref<384x128xf32, #tpu.memory_space<vmem>>, %arg3: memref<1x128xf32, #tpu.memory_space<vmem>>, %arg4: memref<1x128xf32, #tpu.memory_space<vmem>>, %arg5: memref<1x128xf32, #tpu.memory_space<vmem>>, %arg6: memref<384x128xf32, #tpu.memory_space<vmem>>, %arg7: memref<1x128xf32, #tpu.memory_space<vmem>>, %arg8: memref<1x128xf32, #tpu.memory_space<vmem>>, %arg9: memref<1x128xf32, #tpu.memory_space<vmem>>, %arg10: memref<128x128xf32, #tpu.memory_space<vmem>>, %arg11: memref<4x16x128xf32, #tpu.memory_space<vmem>>) attributes {dimension_semantics = [#tpu.dimension_semantics<parallel>], iteration_bounds = array<i64: 2>, scalar_prefetch = 0 : i64, scratch_operands = 0 : i64, tpu.core_type = #tpu.core_type<tc>, window_params = [{transform_indices = @transform_0, window_bounds = array<i64: 4, 16, 128>}, {pipeline_mode = #tpu.pipeline_mode<synchronous>, transform_indices = @transform_1, window_bounds = array<i64: 384, 128>}, {pipeline_mode = #tpu.pipeline_mode<synchronous>, transform_indices = @transform_2, window_bounds = array<i64: 1, 128>}, {pipeline_mode = #tpu.pipeline_mode<synchronous>, transform_indices = @transform_3, window_bounds = array<i64: 1, 128>}, {pipeline_mode = #tpu.pipeline_mode<synchronous>, transform_indices = @transform_4, window_bounds = array<i64: 1, 128>}, {pipeline_mode = #tpu.pipeline_mode<synchronous>, transform_indices = @transform_5, window_bounds = array<i64: 384, 128>}, {pipeline_mode = #tpu.pipeline_mode<synchronous>, transform_indices = @transform_6, window_bounds = array<i64: 1, 128>}, {pipeline_mode = #tpu.pipeline_mode<synchronous>, transform_indices = @transform_7, window_bounds = array<i64: 1, 128>}, {pipeline_mode = #tpu.pipeline_mode<synchronous>, transform_indices = @transform_8, window_bounds = array<i64: 1, 128>}, {pipeline_mode = #tpu.pipeline_mode<synchronous>, transform_indices = @transform_9, window_bounds = array<i64: 128, 128>}, {transform_indices = @transform_10, window_bounds = array<i64: 4, 16, 128>}]} {
    %c0 = arith.constant 0 : index
    %c0_0 = arith.constant 0 : index
    %c0_1 = arith.constant 0 : index
    %0 = vector.load %arg1[%c0, %c0_0, %c0_1] : memref<4x16x128xf32, #tpu.memory_space<vmem>>, vector<4x16x128xf32>
    %1 = tpu.iota {dimensions = array<i32: 0>} : vector<16x1xi32>
    %c0_i32 = arith.constant 0 : i32
    %2 = vector.broadcast %c0_i32 : i32 to vector<16x1xi32>
    %3 = arith.cmpi eq, %1, %2 : vector<16x1xi32>
    %c15_i32 = arith.constant 15 : i32
    %4 = vector.broadcast %c15_i32 : i32 to vector<16x1xi32>
    %5 = arith.cmpi eq, %1, %4 : vector<16x1xi32>
    %c0_2 = arith.constant 0 : index
    %c0_3 = arith.constant 0 : index
    %6 = vector.load %arg3[%c0_2, %c0_3] : memref<1x128xf32, #tpu.memory_space<vmem>>, vector<1x128xf32>
    %7 = vector.shape_cast %0 : vector<4x16x128xf32> to vector<64x128xf32>
    %c1_i32 = arith.constant 1 : i32
    %8 = tpu.dynamic_rotate %7 by %c1_i32 dim 0 : vector<64x128xf32>, i32 -> vector<64x128xf32>
    %9 = vector.shape_cast %8 : vector<64x128xf32> to vector<4x16x128xf32>
    %c63_i32 = arith.constant 63 : i32
    %10 = tpu.dynamic_rotate %7 by %c63_i32 dim 0 : vector<64x128xf32>, i32 -> vector<64x128xf32>
    %11 = vector.shape_cast %10 : vector<64x128xf32> to vector<4x16x128xf32>
    %cst = arith.constant 0.000000e+00 : f32
    %12 = vector.shape_cast %3 : vector<16x1xi1> to vector<1x16x1xi1>
    %13 = vector.broadcast %12 : vector<1x16x1xi1> to vector<4x16x128xi1>
    %14 = vector.broadcast %cst : f32 to vector<4x16x128xf32>
    %15 = arith.select %13, %14, %9 : vector<4x16x128xi1>, vector<4x16x128xf32>
    %cst_4 = arith.constant 0.000000e+00 : f32
    %16 = vector.shape_cast %5 : vector<16x1xi1> to vector<1x16x1xi1>
    %17 = vector.broadcast %16 : vector<1x16x1xi1> to vector<4x16x128xi1>
    %18 = vector.broadcast %cst_4 : f32 to vector<4x16x128xf32>
    %19 = arith.select %17, %18, %11 : vector<4x16x128xi1>, vector<4x16x128xf32>
    %20 = tpu.concatenate %15, %0, %19 in 2 : vector<4x16x128xf32>, vector<4x16x128xf32>, vector<4x16x128xf32> -> vector<4x16x384xf32>
    %21 = vector.shape_cast %20 : vector<4x16x384xf32> to vector<64x384xf32>
    %c0_5 = arith.constant 0 : index
    %c0_6 = arith.constant 0 : index
    %22 = vector.load %arg2[%c0_5, %c0_6] : memref<384x128xf32, #tpu.memory_space<vmem>>, vector<384x128xf32>
    %cst_7 = arith.constant dense<0.000000e+00> : vector<64x128xf32>
    %23 = tpu.matmul %21, %22, %cst_7 {dimension_numbers = #tpu.dot_dimension_numbers<[1], [0], [0], [1], [0, 0, 1, 1], [], []>} : vector<64x384xf32>, vector<384x128xf32>, vector<64x128xf32> -> vector<64x128xf32>
    %24 = vector.shape_cast %23 : vector<64x128xf32> to vector<4x16x128xf32>
    %25 = vector.shape_cast %6 : vector<1x128xf32> to vector<1x1x128xf32>
    %26 = vector.broadcast %25 : vector<1x1x128xf32> to vector<4x16x128xf32>
    %27 = arith.addf %24, %26 : vector<4x16x128xf32>
    %c0_8 = arith.constant 0 : index
    %c0_9 = arith.constant 0 : index
    %28 = vector.load %arg4[%c0_8, %c0_9] : memref<1x128xf32, #tpu.memory_space<vmem>>, vector<1x128xf32>
    %c0_10 = arith.constant 0 : index
    %c0_11 = arith.constant 0 : index
    %29 = vector.load %arg5[%c0_10, %c0_11] : memref<1x128xf32, #tpu.memory_space<vmem>>, vector<1x128xf32>
    %c0_12 = arith.constant 0 : index
    %c0_13 = arith.constant 0 : index
    %30 = vector.load %arg10[%c0_12, %c0_13] : memref<128x128xf32, #tpu.memory_space<vmem>>, vector<128x128xf32>
    %cst_14 = arith.constant dense<0.000000e+00> : vector<4x128xf32>
    %31 = vector.multi_reduction <add>, %27, %cst_14 [1] : vector<4x16x128xf32> to vector<4x128xf32>
    %cst_15 = arith.constant dense<0.000000e+00> : vector<4x128xf32>
    %32 = tpu.matmul %31, %30, %cst_15 {dimension_numbers = #tpu.dot_dimension_numbers<[1], [0], [0], [1], [0, 0, 1, 1], [], []>} : vector<4x128xf32>, vector<128x128xf32>, vector<4x128xf32> -> vector<4x128xf32>
    %33 = vector.shape_cast %32 : vector<4x128xf32> to vector<4x1x128xf32>
    %34 = vector.broadcast %33 : vector<4x1x128xf32> to vector<4x16x128xf32>
    %35 = arith.subf %27, %34 : vector<4x16x128xf32>
    %36 = arith.mulf %35, %35 : vector<4x16x128xf32>
    %cst_16 = arith.constant dense<0.000000e+00> : vector<4x128xf32>
    %37 = vector.multi_reduction <add>, %36, %cst_16 [1] : vector<4x16x128xf32> to vector<4x128xf32>
    %cst_17 = arith.constant dense<0.000000e+00> : vector<4x128xf32>
    %38 = tpu.matmul %37, %30, %cst_17 {dimension_numbers = #tpu.dot_dimension_numbers<[1], [0], [0], [1], [0, 0, 1, 1], [], []>} : vector<4x128xf32>, vector<128x128xf32>, vector<4x128xf32> -> vector<4x128xf32>
    %cst_18 = arith.constant 9.99999974E-6 : f32
    %39 = vector.broadcast %cst_18 : f32 to vector<4x128xf32>
    %40 = arith.addf %38, %39 : vector<4x128xf32>
    %41 = math.rsqrt %40 : vector<4x128xf32>
    %42 = vector.broadcast %28 : vector<1x128xf32> to vector<4x128xf32>
    %43 = arith.mulf %41, %42 : vector<4x128xf32>
    %44 = vector.shape_cast %43 : vector<4x128xf32> to vector<4x1x128xf32>
    %45 = vector.broadcast %44 : vector<4x1x128xf32> to vector<4x16x128xf32>
    %46 = arith.mulf %35, %45 : vector<4x16x128xf32>
    %47 = vector.shape_cast %29 : vector<1x128xf32> to vector<1x1x128xf32>
    %48 = vector.broadcast %47 : vector<1x1x128xf32> to vector<4x16x128xf32>
    %49 = arith.addf %46, %48 : vector<4x16x128xf32>
    %cst_19 = arith.constant 0.00999999977 : f32
    %50 = vector.broadcast %cst_19 : f32 to vector<4x16x128xf32>
    %51 = arith.mulf %50, %49 : vector<4x16x128xf32>
    %52 = arith.maximumf %49, %51 : vector<4x16x128xf32>
    %c0_20 = arith.constant 0 : index
    %c0_21 = arith.constant 0 : index
    %53 = vector.load %arg7[%c0_20, %c0_21] : memref<1x128xf32, #tpu.memory_space<vmem>>, vector<1x128xf32>
    %54 = vector.shape_cast %52 : vector<4x16x128xf32> to vector<64x128xf32>
    %c1_i32_22 = arith.constant 1 : i32
    %55 = tpu.dynamic_rotate %54 by %c1_i32_22 dim 0 : vector<64x128xf32>, i32 -> vector<64x128xf32>
    %56 = vector.shape_cast %55 : vector<64x128xf32> to vector<4x16x128xf32>
    %c63_i32_23 = arith.constant 63 : i32
    %57 = tpu.dynamic_rotate %54 by %c63_i32_23 dim 0 : vector<64x128xf32>, i32 -> vector<64x128xf32>
    %58 = vector.shape_cast %57 : vector<64x128xf32> to vector<4x16x128xf32>
    %cst_24 = arith.constant 0.000000e+00 : f32
    %59 = vector.shape_cast %3 : vector<16x1xi1> to vector<1x16x1xi1>
    %60 = vector.broadcast %59 : vector<1x16x1xi1> to vector<4x16x128xi1>
    %61 = vector.broadcast %cst_24 : f32 to vector<4x16x128xf32>
    %62 = arith.select %60, %61, %56 : vector<4x16x128xi1>, vector<4x16x128xf32>
    %cst_25 = arith.constant 0.000000e+00 : f32
    %63 = vector.shape_cast %5 : vector<16x1xi1> to vector<1x16x1xi1>
    %64 = vector.broadcast %63 : vector<1x16x1xi1> to vector<4x16x128xi1>
    %65 = vector.broadcast %cst_25 : f32 to vector<4x16x128xf32>
    %66 = arith.select %64, %65, %58 : vector<4x16x128xi1>, vector<4x16x128xf32>
    %67 = tpu.concatenate %62, %52, %66 in 2 : vector<4x16x128xf32>, vector<4x16x128xf32>, vector<4x16x128xf32> -> vector<4x16x384xf32>
    %68 = vector.shape_cast %67 : vector<4x16x384xf32> to vector<64x384xf32>
    %c0_26 = arith.constant 0 : index
    %c0_27 = arith.constant 0 : index
    %69 = vector.load %arg6[%c0_26, %c0_27] : memref<384x128xf32, #tpu.memory_space<vmem>>, vector<384x128xf32>
    %cst_28 = arith.constant dense<0.000000e+00> : vector<64x128xf32>
    %70 = tpu.matmul %68, %69, %cst_28 {dimension_numbers = #tpu.dot_dimension_numbers<[1], [0], [0], [1], [0, 0, 1, 1], [], []>} : vector<64x384xf32>, vector<384x128xf32>, vector<64x128xf32> -> vector<64x128xf32>
    %71 = vector.shape_cast %70 : vector<64x128xf32> to vector<4x16x128xf32>
    %72 = vector.shape_cast %53 : vector<1x128xf32> to vector<1x1x128xf32>
    %73 = vector.broadcast %72 : vector<1x1x128xf32> to vector<4x16x128xf32>
    %74 = arith.addf %71, %73 : vector<4x16x128xf32>
    %c0_29 = arith.constant 0 : index
    %c0_30 = arith.constant 0 : index
    %75 = vector.load %arg8[%c0_29, %c0_30] : memref<1x128xf32, #tpu.memory_space<vmem>>, vector<1x128xf32>
    %c0_31 = arith.constant 0 : index
    %c0_32 = arith.constant 0 : index
    %76 = vector.load %arg9[%c0_31, %c0_32] : memref<1x128xf32, #tpu.memory_space<vmem>>, vector<1x128xf32>
    %c0_33 = arith.constant 0 : index
    %c0_34 = arith.constant 0 : index
    %77 = vector.load %arg10[%c0_33, %c0_34] : memref<128x128xf32, #tpu.memory_space<vmem>>, vector<128x128xf32>
    %cst_35 = arith.constant dense<0.000000e+00> : vector<4x128xf32>
    %78 = vector.multi_reduction <add>, %74, %cst_35 [1] : vector<4x16x128xf32> to vector<4x128xf32>
    %cst_36 = arith.constant dense<0.000000e+00> : vector<4x128xf32>
    %79 = tpu.matmul %78, %77, %cst_36 {dimension_numbers = #tpu.dot_dimension_numbers<[1], [0], [0], [1], [0, 0, 1, 1], [], []>} : vector<4x128xf32>, vector<128x128xf32>, vector<4x128xf32> -> vector<4x128xf32>
    %80 = vector.shape_cast %79 : vector<4x128xf32> to vector<4x1x128xf32>
    %81 = vector.broadcast %80 : vector<4x1x128xf32> to vector<4x16x128xf32>
    %82 = arith.subf %74, %81 : vector<4x16x128xf32>
    %83 = arith.mulf %82, %82 : vector<4x16x128xf32>
    %cst_37 = arith.constant dense<0.000000e+00> : vector<4x128xf32>
    %84 = vector.multi_reduction <add>, %83, %cst_37 [1] : vector<4x16x128xf32> to vector<4x128xf32>
    %cst_38 = arith.constant dense<0.000000e+00> : vector<4x128xf32>
    %85 = tpu.matmul %84, %77, %cst_38 {dimension_numbers = #tpu.dot_dimension_numbers<[1], [0], [0], [1], [0, 0, 1, 1], [], []>} : vector<4x128xf32>, vector<128x128xf32>, vector<4x128xf32> -> vector<4x128xf32>
    %cst_39 = arith.constant 9.99999974E-6 : f32
    %86 = vector.broadcast %cst_39 : f32 to vector<4x128xf32>
    %87 = arith.addf %85, %86 : vector<4x128xf32>
    %88 = math.rsqrt %87 : vector<4x128xf32>
    %89 = vector.broadcast %75 : vector<1x128xf32> to vector<4x128xf32>
    %90 = arith.mulf %88, %89 : vector<4x128xf32>
    %91 = vector.shape_cast %90 : vector<4x128xf32> to vector<4x1x128xf32>
    %92 = vector.broadcast %91 : vector<4x1x128xf32> to vector<4x16x128xf32>
    %93 = arith.mulf %82, %92 : vector<4x16x128xf32>
    %94 = vector.shape_cast %76 : vector<1x128xf32> to vector<1x1x128xf32>
    %95 = vector.broadcast %94 : vector<1x1x128xf32> to vector<4x16x128xf32>
    %96 = arith.addf %93, %95 : vector<4x16x128xf32>
    %97 = arith.addf %0, %96 : vector<4x16x128xf32>
    %cst_40 = arith.constant 0.00999999977 : f32
    %98 = vector.broadcast %cst_40 : f32 to vector<4x16x128xf32>
    %99 = arith.mulf %98, %97 : vector<4x16x128xf32>
    %100 = arith.maximumf %97, %99 : vector<4x16x128xf32>
    %c0_41 = arith.constant 0 : index
    %c0_42 = arith.constant 0 : index
    %c0_43 = arith.constant 0 : index
    %101 = vector.load %arg11[%c0_41, %c0_42, %c0_43] : memref<4x16x128xf32, #tpu.memory_space<vmem>>, vector<4x16x128xf32>
    tpu.vector_store %arg11[%c0_41, %c0_42, %c0_43], %100 {strides = array<i32>} : memref<4x16x128xf32, #tpu.memory_space<vmem>>, vector<4x16x128xf32>,
    return
  }
  func.func @transform_0(%arg0: i32) -> (i32, i32, i32) {
    %c0_i32 = arith.constant 0 : i32
    %c0_i32_0 = arith.constant 0 : i32
    %c0_i32_1 = arith.constant 0 : i32
    return %arg0, %c0_i32, %c0_i32_0 : i32, i32, i32
  }
  func.func @transform_1(%arg0: i32) -> (i32, i32) {
    %c0_i32 = arith.constant 0 : i32
    %c0_i32_0 = arith.constant 0 : i32
    %c0_i32_1 = arith.constant 0 : i32
    return %c0_i32, %c0_i32_0 : i32, i32
  }
  func.func @transform_2(%arg0: i32) -> (i32, i32) {
    %c0_i32 = arith.constant 0 : i32
    %c0_i32_0 = arith.constant 0 : i32
    %c0_i32_1 = arith.constant 0 : i32
    return %c0_i32, %c0_i32_0 : i32, i32
  }
  func.func @transform_3(%arg0: i32) -> (i32, i32) {
    %c0_i32 = arith.constant 0 : i32
    %c0_i32_0 = arith.constant 0 : i32
    %c0_i32_1 = arith.constant 0 : i32
    return %c0_i32, %c0_i32_0 : i32, i32
  }
  func.func @transform_4(%arg0: i32) -> (i32, i32) {
    %c0_i32 = arith.constant 0 : i32
    %c0_i32_0 = arith.constant 0 : i32
    %c0_i32_1 = arith.constant 0 : i32
    return %c0_i32, %c0_i32_0 : i32, i32
  }
  func.func @transform_5(%arg0: i32) -> (i32, i32) {
    %c0_i32 = arith.constant 0 : i32
    %c0_i32_0 = arith.constant 0 : i32
    %c0_i32_1 = arith.constant 0 : i32
    return %c0_i32, %c0_i32_0 : i32, i32
  }
  func.func @transform_6(%arg0: i32) -> (i32, i32) {
    %c0_i32 = arith.constant 0 : i32
    %c0_i32_0 = arith.constant 0 : i32
    %c0_i32_1 = arith.constant 0 : i32
    return %c0_i32, %c0_i32_0 : i32, i32
  }
  func.func @transform_7(%arg0: i32) -> (i32, i32) {
    %c0_i32 = arith.constant 0 : i32
    %c0_i32_0 = arith.constant 0 : i32
    %c0_i32_1 = arith.constant 0 : i32
    return %c0_i32, %c0_i32_0 : i32, i32
  }
  func.func @transform_8(%arg0: i32) -> (i32, i32) {
    %c0_i32 = arith.constant 0 : i32
    %c0_i32_0 = arith.constant 0 : i32
    %c0_i32_1 = arith.constant 0 : i32
    return %c0_i32, %c0_i32_0 : i32, i32
  }
  func.func @transform_9(%arg0: i32) -> (i32, i32) {
    %c0_i32 = arith.constant 0 : i32
    %c0_i32_0 = arith.constant 0 : i32
    %c0_i32_1 = arith.constant 0 : i32
    return %c0_i32, %c0_i32_0 : i32, i32
  }
  func.func @transform_10(%arg0: i32) -> (i32, i32, i32) {
    %c0_i32 = arith.constant 0 : i32
    %c0_i32_0 = arith.constant 0 : i32
    %c0_i32_1 = arith.constant 0 : i32
    return %arg0, %c0_i32, %c0_i32_0 : i32, i32, i32
  }
}

</mosaic_0001>

<bundles_post_ra>
// kernel: tpu_custom_call.1
= control target key start
LH: loop header
LB: loop body
LE: loop exit
PB: predicated region body
PF: predicated region fallthrough
CT: control target
= control target key end

     0   :  { %s2468_s0 = inlined_call_operand.hbm [shape: f32[8,16,128], index: 0, kind: input, shape index: {}]   ;;  %s2469_s1 = inlined_call_operand.hbm [shape: f32[384,128], index: 1, kind: input, shape index: {}]   ;;  %s2470_s2 = inlined_call_operand.vmem [shape: f32[1,128], index: 2, kind: input, shape index: {}]   ;;  %s2471_s3 = inlined_call_operand.vmem [shape: f32[1,128], index: 3, kind: input, shape index: {}]   ;;  %s2472_s4 = inlined_call_operand.vmem [shape: f32[1,128], index: 4, kind: input, shape index: {}]   ;;  %s2473_s5 = inlined_call_operand.hbm [shape: f32[384,128], index: 5, kind: input, shape index: {}]   ;;  %s2474_s6 = inlined_call_operand.vmem [shape: f32[1,128], index: 6, kind: input, shape index: {}]   ;;  %s2475_s7 = inlined_call_operand.vmem [shape: f32[1,128], index: 7, kind: input, shape index: {}]   ;;  %s2476_s8 = inlined_call_operand.vmem [shape: f32[1,128], index: 8, kind: input, shape index: {}]   ;;  %s2477_s9 = inlined_call_operand.hbm [shape: f32[128,128], index: 9, kind: input, shape index: {}]   ;;  %s2478_s10 = inlined_call_operand.hbm [shape: f32[8,16,128], index: 10, kind: output, shape index: {}]  }
   0x1   :  { %2481 = sst [smem:[#allocation16_spill]] %s2469_s1 }
   0x2   :  { %2482 = sst [smem:[#allocation17_spill]] %s2473_s5 }
   0x3   :  { %2483 = sst [smem:[#allocation18_spill]] %s2477_s9 }
   0x4   :  { %15 = vsyncpa [#allocation3], 0 }
   0x5   :  { %17 = vsyncpa [#allocation3 + $0x1], 0 }
   0x6   :  { %18 = vsyncpa [#allocation6], 0 }
   0x7   :  { %19 = vsyncpa [#allocation9], 0 }
   0x8   :  { %20 = vsyncpa [#allocation4], 0 }
   0x9   :  { %22 = vsyncpa [#allocation4 + $0x1], 0  ;;  %s1897_s13 = smov 0   ;;  %s1899_s14 = smov 0  }
   0xa   :  { %s1901_s15 = smov 0   ;;  %s1903_s16 = smov 0  }
   0xb LB: > { %s1918_s17 = sadd.s32 4294967295, %s1833_s16   ;;  %s1480_s18 = sadd.s32 4294967294, %s1833_s16   ;;  %s1833_s16 = sphi %s1903_s16, %s2501_s16   ;;  %s1829_s15 = sphi %s1901_s15, %s2500_s15   ;;  %s1825_s14 = sphi %s1899_s14, %s2499_s14   ;;  %s1821_s13 = sphi %s1897_s13, %s2498_s13  }
   0xc   : > { %p48_p0 = scmp.ne.s32.totalorder %s1825_s14, %s1821_s13  ;;  %p49_p1 = scmp.eq.s32.totalorder %s1918_s17, 0 }
   0xd   : > { %p261_p2 = scmp.eq.s32.totalorder %s1918_s17, 1  ;;  %p267_p3 = scmp.eq.s32.totalorder %s1480_s18, 1 }
   0xe   : > { %p1927_p4 = por %p49_p1, %p48_p0  ;;  %p1481_p5 = scmp.ge.s32.totalorder %s1833_s16, 1 }
   0xf   : > { %p1932_p6 = por %p267_p3, %p48_p0  ;;  %p274_p7 = scmp.lt.s32.totalorder %s1833_s16, 3 }
  0x10   : > { %s2486_s1 = sld [smem:[#allocation16_spill]]  ;;  %s1835_s25 = smov [#allocation5]  }
  0x11   : > { %p1940_p8 = pnand %p1481_p5, %p274_p7  ;;  %s287_s26 = sshll.u32 %s1835_s25, 4  ;;  %s288_s26 = int_to_ptr.vmem [resolvable:$true] %s287_s26 }
  0x12   : > { %s2489_s5 = sld [smem:[#allocation17_spill]]  ;;  %s2479_s11 = smov 128  }
  0x13   : > { %p1556_p9 = pneg %p1940_p8  ;;  %s2480_s12 = smov 8  }
  0x14   : > { %s1838_s18 = smov [#allocation7]   ;;  %s2490_s9 = sld [smem:[#allocation18_spill]] }
  0x15   : > { %p1948_p10 = pnand %p1556_p9, %p49_p1  ;;  %s310_s21 = sshll.u32 %s1838_s18, 4  ;;  %s311_s21 = int_to_ptr.vmem [resolvable:$true] %s310_s21 }
  0x16   : > { %s285_s23 = sshll.u32 %s2486_s1, 4  ;;  %s1970_s29 = sadd.s32 1, %s1833_s16   ;;  %s286_s23 = int_to_ptr.hbm [resolvable:$true] %s285_s23 }
  0x17   : > { %1559 = dma.hbm_to_vmem [thread:$0]  (!%p1948_p10), %s286_s23, 6144, %s288_s26, [#allocation6], %s2479_s11, %s2479_s11, %s2480_s12  }
  0x18   : > { %s308_s30 = sshll.u32 %s2489_s5, 4  ;;  %s1839_s23 = smov [#allocation8]   ;;  %s309_s30 = int_to_ptr.hbm [resolvable:$true] %s308_s30 }
  0x19   : > { %1562 = dma.hbm_to_vmem [thread:$0]  (!%p1948_p10), %s309_s30, 6144, %s311_s21, [#allocation6], %s2479_s11, %s2479_s11, %s2480_s12  }
  0x1a   : > { %s331_s28 = sshll.u32 %s2490_s9, 4  ;;  %s333_s26 = sshll.u32 %s1839_s23, 4  ;;  %s332_s28 = int_to_ptr.hbm [resolvable:$true] %s331_s28  ;;  %s334_s26 = int_to_ptr.vmem [resolvable:$true] %s333_s26 }
  0x1b   : > { %1565 = dma.hbm_to_vmem [thread:$0]  (!%p1948_p10), %s332_s28, 2048, %s334_s26, [#allocation9], %s2479_s11, %s2479_s11, %s2480_s12  }
  0x1c   : > { %s32_s18 = ssub.s32 %s1833_s16, %s1970_s29  ;;  %s35_s22 = sadd.s32 1, %s1829_s15 }
  0x1d   : > { %p33_p12 = scmp.eq.s32.totalorder %s32_s18, 0  ;;  %p42_p13 = scmp.ne.s32.totalorder %s1829_s15, %s1825_s14 }
  0x1e   : > { %p43_p0 = scmp.eq.s32.totalorder %s1833_s16, 0  ;;  %p1577_p5 = scmp.lt.s32.totalorder %s1833_s16, 2 }
  0x1f   : > { %s1984_s25 = scalar_select %p33_p12, %s1829_s15, %s35_s22  }
  0x20   : > { %p1988_p3 = por %p261_p2, %p42_p13  ;;  %s347_s21 = sand.u32 1, %s1829_s15  }
  0x21   : > { %2491 = sst [smem:[#allocation15_spill]] %s1984_s25  ;;  %s1535_s27 = sshll.u32 %s1833_s16, 6 }
  0x22   : > { %p44_p7 = por %p43_p0, %p42_p13  ;;  %s1486_s23 = sshll.u32 %s347_s21, 6 }
  0x23   : > { %s357_s28 = scalar_lea.hbm %s2468_s0, %s1535_s27  ;;  %s351_s18 = scalar_lea.vmem [#allocation2], %s1486_s23 }
  0x24   : > { %s358_s26 = sshll.u32 %s357_s28, 4  ;;  %s360_s11 = sshll.u32 %s351_s18, 4  ;;  %s359_s26 = int_to_ptr.hbm [resolvable:$true] %s358_s26  ;;  %s361_s11 = int_to_ptr.vmem [resolvable:$true] %s360_s11 }
  0x25   : > { %p1998_p9 = pnand %p1577_p5, %p44_p7  ;;  %s348_s12 = scalar_lea.sflag [#allocation3], %s347_s21 }
  0x26   : > { %s1729_s9 = sshra.s32 %s359_s26, 4  ;;  %s1736_s27 = scalar_lea.hbm %s2468_s0, 128  ;;  %s1730_s9 = int_to_ptr.hbm [resolvable:$true] %s1729_s9 }
  0x27   : > { %s1731_s25 = scalar_lea.hbm %s1730_s9, 64  ;;  %p1733_p10 = pneg %p1998_p9 }
  0x28   : > { %p1732_p2 = scmp.ne.s32.totalorder %s1730_s9, %s1731_s25  ;;  %p1737_p0 = scmp.lt.s32.totalorder %s1730_s9, %s2468_s0 }
  0x29   : > { %p1738_p5 = scmp.lt.s32.totalorder %s1736_s27, %s1731_s25 }
  0x2a   : > { %p1734_p12 = pnand %p1733_p10, %p1732_p2 }
  0x2b   : > { %p1739_p7 = por %p1738_p5, %p1737_p0 }
  0x2c   : > { %p1735_p13 = pneg %p1734_p12 }
  0x2e   : > { %p1740_p11 = pnand %p1739_p7, %p1735_p13 }
  0x30   : > { %1743 = shalt.err (!%p1740_p11)
}
  0x31   : > { %s2494_s21 = smov 8   ;;  %s2495_s18 = smov 128  }
  0x32   : > { %1569 = dma.hbm_to_vmem [thread:$0]  (!%p1998_p9), %s359_s26, 1024, %s361_s11, %s348_s12, %s2495_s18, %s2495_s18, %s2494_s21  }
  0x33   : > { %372 = sbr.rel (%p1940_p8) target bundleno = 1166 (0x48e), region = 60  ;;  %s2018_s1 = sand.u32 (!%p1940_p8), 1, %s1825_s14  }
  0x34   : > { %s1491_s9 = sshll.u32 (!%p1940_p8), %s2018_s1, 6  ;;  %s375_s25 = scalar_lea.sflag (!%p1940_p8), [#allocation3], %s2018_s1 }
  0x35   : > { %s2024_s5 = scalar_lea.vmem (!%p1940_p8), [#allocation2], %s1491_s9 }
  0x38   : > { %1804 = dma.done.wait (%p1927_p4), %s375_s25, 1024  }
  0x39   : > { %1806 = vsyncadd (%p1927_p4), %s375_s25, 4294966272 }
  0x3a   : > { %1808 = dma.done.wait (%p49_p1), [#allocation6], 12288  }
  0x3b   : > { %1810 = vsyncadd (%p49_p1), [#allocation6], 4294955008 }
  0x3c   : > { %1812 = dma.done.wait (%p49_p1), [#allocation9], 2048  }
  0x3d   : > { %1814 = vsyncadd (%p49_p1), [#allocation9], 4294965248  ;;  %v554_v0 = vld [vmem:[#allocation5 + $0x178] sm:$0xff]  ;;  %v553_v1 = vld [vmem:[#allocation5 + $0x170] sm:$0xff]  ;;  %v441_v33 = vlaneseq  ;;  %vm739_vm4 = vcmask 1041409   ;;  %vm741_vm5 = vcmask 1042434  }
  0x3e   : > { %v522_v2 = vld [vmem:[#allocation5 + $0x78] sm:$0xff]  ;;  %637 = vmatpush.msra.mxu2 %v554_v0  ;;  %v521_v4 = vld [vmem:[#allocation5 + $0x70] sm:$0xff]  ;;  %v552_v5 = vld [vmem:[#allocation5 + $0x168] sm:$0xff]  ;;  %vm743_vm6 = vcmask 1043459   ;;  %s1537_s19 = sshll.u32 %s1918_s17, 6  ;;  %s430_s17 = scalar_lea.vmem [#allocation10], %s1491_s9 }
  0x3f   : > { %555 = vmatpush.msra.mxu0 %v522_v2  ;;  %v538_v3 = vld [vmem:[#allocation5 + $0xf8] sm:$0xff]  ;;  %v537_v6 = vld [vmem:[#allocation5 + $0xf0] sm:$0xff]  ;;  %v520_v7 = vld [vmem:[#allocation5 + $0x68] sm:$0xff]  ;;  %v2042_v41 = vshrl.u32 %v441_v33, 7  ;;  %s1374_s12 = scalar_lea.hbm %s2478_s10, %s1537_s19  ;;  %s1362_s22 = scalar_lea.sflag [#allocation4], %s2018_s1 }
  0x40   : > { %596 = vmatpush.msra.mxu1 %v538_v3  ;;  %638 = vmatpush.msra.mxu2 %v553_v1  ;;  %v536_v8 = vld [vmem:[#allocation5 + $0xe8] sm:$0xff]  ;;  %v551_v9 = vld [vmem:[#allocation5 + $0x160] sm:$0xff]  ;;  %v550_v12 = vld [vmem:[#allocation5 + $0x158] sm:$0xff]  ;;  %s1377_s26 = sshll.u32 %s1374_s12, 4  ;;  %s1779_s21 = scalar_lea.hbm %s2478_s10, 128  ;;  %s1378_s26 = int_to_ptr.hbm [resolvable:$true] %s1377_s26 }
  0x41   : > { %556 = vmatpush.msra.mxu0 %v521_v4  ;;  %v519_v10 = vld [vmem:[#allocation5 + $0x60] sm:$0xff]  ;;  %v518_v13 = vld [vmem:[#allocation5 + $0x58] sm:$0xff]  ;;  %v549_v15 = vld [vmem:[#allocation5 + $0x150] sm:$0xff]  ;;  %vm474_vm0 = vcmp.lt.s32.totalorder %v2042_v41, 7  ;;  %vm457_vm1 = vcmp.lt.s32.totalorder %v2042_v41, 1  ;;  %vm1538_vm2 = vcmp.ne.s32.totalorder %v2042_v41, 0 }
  0x42   : > { %597 = vmatpush.msra.mxu1 %v537_v6  ;;  %639 = vmatpush.msra.mxu2 %v552_v5  ;;  %v535_v11 = vld [vmem:[#allocation5 + $0xe0] sm:$0xff]  ;;  %v534_v14 = vld [vmem:[#allocation5 + $0xd8] sm:$0xff]  ;;  %v517_v16 = vld [vmem:[#allocation5 + $0x50] sm:$0xff]  ;;  %v2066_v60 = vadd.s32 8, %v2042_v41  ;;  %s1773_s27 = sshra.s32 %s1378_s26, 4  ;;  %s1774_s27 = int_to_ptr.hbm [resolvable:$true] %s1773_s27 }
  0x43   : > { %557 = vmatpush.msra.mxu0 %v520_v7  ;;  %v533_v17 = vld [vmem:[#allocation5 + $0xd0] sm:$0xff]  ;;  %v548_v18 = vld [vmem:[#allocation5 + $0x148] sm:$0xff]  ;;  %v547_v21 = vld [vmem:[#allocation5 + $0x140] sm:$0xff]  ;;  %s1775_s9 = scalar_lea.hbm %s1774_s27, 64  ;;  %p1780_p11 = scmp.lt.s32.totalorder %s1774_s27, %s2478_s10 }
  0x44   : > { %598 = vmatpush.msra.mxu1 %v536_v8  ;;  %640 = vmatpush.msra.mxu2 %v551_v9  ;;  %v516_v19 = vld [vmem:[#allocation5 + $0x48] sm:$0xff]  ;;  %v515_v22 = vld [vmem:[#allocation5 + $0x40] sm:$0xff]  ;;  %v546_v24 = vld [vmem:[#allocation5 + $0x138] sm:$0xff]  ;;  %vm1539_vm3 = vcmp.ne.s32.totalorder %v2066_v60, 15  ;;  %p1776_p1 = scmp.ne.s32.totalorder %s1774_s27, %s1775_s9  ;;  %p1781_p9 = scmp.lt.s32.totalorder %s1779_s21, %s1775_s9 }
  0x45   : > { %558 = vmatpush.msra.mxu0 %v519_v10  ;;  %v532_v20 = vld [vmem:[#allocation5 + $0xc8] sm:$0xff]  ;;  %v531_v23 = vld [vmem:[#allocation5 + $0xc0] sm:$0xff]  ;;  %v514_v25 = vld [vmem:[#allocation5 + $0x38] sm:$0xff] }
  0x46   : > { %599 = vmatpush.msra.mxu1 %v535_v11  ;;  %641 = vmatpush.msra.mxu2 %v550_v12  ;;  %v530_v26 = vld [vmem:[#allocation5 + $0xb8] sm:$0xff]  ;;  %v545_v27 = vld [vmem:[#allocation5 + $0x130] sm:$0xff]  ;;  %v544_v29 = vld [vmem:[#allocation5 + $0x128] sm:$0xff]  ;;  %p1777_p4 = pnand %p1776_p1, %p1988_p3  ;;  %p1782_p2 = por %p1781_p9, %p1780_p11 }
  0x47   : > { %559 = vmatpush.msra.mxu0 %v518_v13  ;;  %v513_v28 = vld [vmem:[#allocation5 + $0x30] sm:$0xff]  ;;  %v543_v31 = vld [vmem:[#allocation5 + $0x120] sm:$0xff]  ;;  %v512_v32 = vld [vmem:[#allocation5 + $0x28] sm:$0xff] }
  0x48   : > { %600 = vmatpush.msra.mxu1 %v534_v14  ;;  %642 = vmatpush.msra.mxu2 %v549_v15  ;;  %v529_v30 = vld [vmem:[#allocation5 + $0xb0] sm:$0xff]  ;;  %v528_v34 = vld [vmem:[#allocation5 + $0xa8] sm:$0xff]  ;;  %v511_v35 = vld [vmem:[#allocation5 + $0x20] sm:$0xff]  ;;  %p1778_p8 = pneg %p1777_p4 }
  0x49   : > { %560 = vmatpush.msra.mxu0 %v517_v16  ;;  %v542_v36 = vld [vmem:[#allocation5 + $0x118] sm:$0xff]  ;;  %v527_v37 = vld [vmem:[#allocation5 + $0xa0] sm:$0xff]  ;;  %v434_v40 = vld [vmem:[%s2024_s5 + $0x8] sm:$0xff] }
  0x4a   : > { %601 = vmatpush.msra.mxu1 %v533_v17  ;;  %643 = vmatpush.msra.mxu2 %v548_v18  ;;  %v510_v38 = vld [vmem:[#allocation5 + $0x18] sm:$0xff]  ;;  %v2039_v39 = vld [vmem:[%s2024_s5] sm:$0xff]  ;;  %v541_v44 = vld [vmem:[#allocation5 + $0x110] sm:$0xff]  ;;  %v467_v48 = vrot.slane %v434_v40, 1  ;;  %v450_v62 = vrot.slane %v434_v40, 7  ;;  %p1783_p10 = pnand %p1782_p2, %p1778_p8 }
  0x4b   : > { %561 = vmatpush.msra.mxu0 %v516_v19  ;;  %v526_v42 = vld [vmem:[#allocation5 + $0x98] sm:$0xff]  ;;  %v509_v45 = vld [vmem:[#allocation5 + $0x10] sm:$0xff]  ;;  %v466_v47 = vrot.slane %v2039_v39, 1  ;;  %v540_v49 = vld [vmem:[#allocation5 + $0x108] sm:$0xff]  ;;  %v449_v51 = vrot.slane %v2039_v39, 7 }
  0x4c   : > { %602 = vmatpush.msra.mxu1 %v532_v20  ;;  %644 = vmatpush.msra.mxu2 %v547_v21  ;;  %v2045_v43 = vld [vmem:[%s2024_s5 + $0x38] sm:$0xff]  ;;  %v525_v46 = vld [vmem:[#allocation5 + $0x90] sm:$0xff]  ;;  %v508_v50 = vld [vmem:[#allocation5 + $0x8] sm:$0xff] }
  0x4d   : > { %562 = vmatpush.msra.mxu0 %v515_v22  ;;  %v456_v52 = vrot.slane %v2045_v43, 7  ;;  %v524_v53 = vld [vmem:[#allocation5 + $0x88] sm:$0xff]  ;;  %v539_v54 = vld [vmem:[#allocation5 + $0x100] sm:$0xff]  ;;  %v481_v56 = vsel %vm474_vm0, %v466_v47, %v467_v48  ;;  %v435_v59 = vld [vmem:[%s2024_s5 + $0x10] sm:$0xff]  ;;  %v464_v0 = vsel %vm457_vm1, %v449_v51, %v450_v62  ;;  %v473_v21 = vrot.slane %v2045_v43, 1 }
  0x4e   : > { %603 = vmatpush.msra.mxu1 %v531_v23  ;;  %645 = vmatpush.msra.mxu2 %v546_v24  ;;  %v507_v55 = vld [vmem:[#allocation5] sm:$0xff]  ;;  %v468_v61 = vrot.slane %v435_v59, 1  ;;  %v436_v1 = vld [vmem:[%s2024_s5 + $0x18] sm:$0xff]  ;;  %v451_v3 = vrot.slane %v435_v59, 7  ;;  %v438_v11 = vld [vmem:[%s2024_s5 + $0x28] sm:$0xff] }
  0x4f   : > { %563 = vmatpush.msra.mxu0 %v514_v25  ;;  %v523_v57 = vld [vmem:[#allocation5 + $0x80] sm:$0xff]  ;;  %v465_v58 = vsel %vm457_vm1, %v456_v52, %v449_v51  ;;  %v469_v2 = vrot.slane %v436_v1, 1  ;;  %v452_v8 = vrot.slane %v436_v1, 7  ;;  %v471_v12 = vrot.slane %v438_v11, 1  ;;  %v439_v16 = vld [vmem:[%s2024_s5 + $0x30] sm:$0xff] }
  0x50   : > { %604 = vmatpush.msra.mxu1 %v530_v26  ;;  %646 = vmatpush.msra.mxu2 %v545_v27  ;;  %v480_v63 = vsel %vm474_vm0, %v467_v48, %v468_v61  ;;  %v463_v5 = vsel %vm457_vm1, %v450_v62, %v451_v3  ;;  %v437_v6 = vld [vmem:[%s2024_s5 + $0x20] sm:$0xff]  ;;  %v472_v17 = vrot.slane %v439_v16, 1  ;;  %v454_v18 = vrot.slane %v438_v11, 7  ;;  %v2148_v51 = vld [vmem:[#allocation8 + $0x30] sm:$0xff] }
  0x51   : > { %564 = vmatpush.msra.mxu0 %v513_v28  ;;  %v479_v4 = vsel %vm474_vm0, %v468_v61, %v469_v2  ;;  %v470_v7 = vrot.slane %v437_v6, 1  ;;  %v462_v10 = vsel %vm457_vm1, %v451_v3, %v452_v8  ;;  %v453_v13 = vrot.slane %v437_v6, 7  ;;  %v2157_v61 = vld [vmem:[#allocation8 + $0x18] sm:$0xff]  ;;  %v2162_v3 = vld [vmem:[#allocation8 + $0x8] sm:$0xff] }
  0x52   : > { %605 = vmatpush.msra.mxu1 %v529_v30  ;;  %647 = vmatpush.msra.mxu2 %v544_v29  ;;  %v476_v19 = vsel %vm474_vm0, %v471_v12, %v472_v17  ;;  %v455_v22 = vrot.slane %v439_v16, 7  ;;  %v475_v23 = vsel %vm474_vm0, %v472_v17, %v473_v21  ;;  %v482_v25 = vsel %vm474_vm0, %v473_v21, %v466_v47  ;;  %v2142_v47 = vld [vmem:[#allocation8 + $0x40] sm:$0xff] }
  0x53   : > { %565 = vmatpush.msra.mxu0 %v512_v32  ;;  %v478_v9 = vsel %vm474_vm0, %v469_v2, %v470_v7  ;;  %v477_v14 = vsel %vm474_vm0, %v470_v7, %v471_v12  ;;  %v461_v15 = vsel %vm457_vm1, %v452_v8, %v453_v13  ;;  %v460_v20 = vsel %vm457_vm1, %v453_v13, %v454_v18 }
  0x54   : > { %606 = vmatpush.msra.mxu1 %v528_v34  ;;  %648 = vmatpush.msra.mxu2 %v543_v31  ;;  %v459_v24 = vsel %vm457_vm1, %v454_v18, %v455_v22  ;;  %v458_v26 = vsel %vm457_vm1, %v455_v22, %v456_v52 }
  0x55   : > { %566 = vmatpush.msra.mxu0 %v511_v35  ;;  %v2121_v35 = vld [vmem:[#allocation8 + $0x78] sm:$0xff] }
  0x56   : > { %607 = vmatpush.msra.mxu1 %v527_v37  ;;  %649 = vmatpush.msra.mxu2 %v542_v36  ;;  %v2124_v36 = vld [vmem:[#allocation8 + $0x70] sm:$0xff] }
  0x57   : > { %567 = vmatpush.msra.mxu0 %v510_v38  ;;  %746 = vmatpush.msra.mxu3 %v2121_v35  ;;  %v2127_v38 = vld [vmem:[#allocation8 + $0x68] sm:$0xff] }
  0x58   : > { %608 = vmatpush.msra.mxu1 %v526_v42  ;;  %650 = vmatpush.msra.mxu2 %v541_v44  ;;  %v2136_v44 = vld [vmem:[#allocation8 + $0x50] sm:$0xff] }
  0x59   : > { %568 = vmatpush.msra.mxu0 %v509_v45  ;;  %747 = vmatpush.msra.mxu3 %v2124_v36 }
  0x5a   : > { %609 = vmatpush.msra.mxu1 %v525_v46  ;;  %651 = vmatpush.msra.mxu2 %v540_v49  ;;  %v2139_v46 = vld [vmem:[#allocation8 + $0x48] sm:$0xff] }
  0x5b   : > { %569 = vmatpush.msra.mxu0 %v508_v50  ;;  %748 = vmatpush.msra.mxu3 %v2127_v38  ;;  %v2145_v50 = vld [vmem:[#allocation8 + $0x38] sm:$0xff] }
  0x5c   : > { %610 = vmatpush.msra.mxu1 %v524_v53  ;;  %652 = vmatpush.msra.mxu2 %v539_v54  ;;  %v2151_v53 = vld [vmem:[#allocation8 + $0x28] sm:$0xff] }
  0x5d   : > { %570 = vmatpush.msra.mxu0 %v507_v55  ;;  %653 = vmatmul.f32.vlgmr.msra.gmra.mxu2 %v481_v56  ;;  %v2154_v55 = vld [vmem:[#allocation8 + $0x20] sm:$0xff] }
  0x5e   : > { %611 = vmatpush.msra.mxu1 %v523_v57  ;;  %1497 = vmatmul.msk.f32.vlgmr.msra.gmra.mxu0 %vm1538_vm2, %v465_v58 }
  0x5f   : > { %612 = vmatmul.f32.vlgmr.msra.gmra.mxu1 %v2039_v39  ;;  %v2130_v39 = vld [vmem:[#allocation8 + $0x60] sm:$0xff] }
  0x60   : > { %749 = vmatpush.msra.mxu3 %v2130_v39 }
  0x65   : > { %1505 = vmatmul.msk.f32.gmra.mxu2 %vm1539_vm3, %v480_v63  ;;  %v2159_v63 = vld [vmem:[#allocation8 + $0x10] sm:$0xff] }
  0x66   : > { %574 = vmatmul.f32.gmra.mxu0 %v464_v0 }
  0x67   : > { %615 = vmatmul.f32.gmra.mxu1 %v434_v40 }
  0x6d   : > { %659 = vmatmul.f32.gmra.mxu2 %v479_v4  ;;  %v1621_v4 = vld [vmem:[%s2470_s2] ss:$0 sm:$0xff] }
  0x6e   : > { %1499 = vmatmul.msk.f32.gmra.mxu0 %vm1538_vm2, %v463_v5 }
  0x6f   : > { %618 = vmatmul.f32.gmra.mxu1 %v435_v59 }
  0x75   : > { %1507 = vmatmul.msk.f32.gmra.mxu2 %vm1539_vm3, %v478_v9  ;;  %v2168_v9 = vld [vmem:[#allocation8] sm:$0xff] }
  0x76   : > { %580 = vmatmul.f32.gmra.mxu0 %v462_v10 }
  0x77   : > { %621 = vmatmul.f32.gmra.mxu1 %v436_v1 }
  0x7d   : > { %665 = vmatmul.f32.gmra.mxu2 %v477_v14 }
  0x7e   : > { %1501 = vmatmul.msk.f32.gmra.mxu0 %vm1538_vm2, %v461_v15 }
  0x7f   : > { %624 = vmatmul.f32.gmra.mxu1 %v437_v6 }
  0x85   : > { %1509 = vmatmul.msk.f32.gmra.mxu2 %vm1539_vm3, %v476_v19 }
  0x86   : > { %586 = vmatmul.f32.gmra.mxu0 %v460_v20 }
  0x87   : > { %627 = vmatmul.f32.gmra.mxu1 %v438_v11 }
  0x8d   : > { %671 = vmatmul.f32.gmra.mxu2 %v475_v23 }
  0x8e   : > { %1503 = vmatmul.msk.f32.gmra.mxu0 %vm1538_vm2, %v459_v24 }
  0x8f   : > { %630 = vmatmul.f32.gmra.mxu1 %v439_v16 }
  0x95   : > { %1511 = vmatmul.msk.f32.gmra.mxu2 %vm1539_vm3, %v482_v25 }
  0x96   : > { %592 = vmatmul.f32.gmra.mxu0 %v458_v26 }
  0x97   : > { %633 = vmatmul.f32.gmra.mxu1 %v2045_v43  ;;  %v2133_v43 = vld [vmem:[#allocation8 + $0x58] sm:$0xff] }
  0x98   : > { %750 = vmatpush.msra.mxu3 %v2133_v43 }
  0x9a   : > { %751 = vmatpush.msra.mxu3 %v2136_v44 }
  0x9c   : > { %752 = vmatpush.msra.mxu3 %v2139_v46 }
  0x9e   : > { %753 = vmatpush.msra.mxu3 %v2142_v47 }
  0xa0   : > { %754 = vmatpush.msra.mxu3 %v2145_v50 }
  0xa2   : > { %755 = vmatpush.msra.mxu3 %v2148_v51 }
  0xa4   : > { %756 = vmatpush.msra.mxu3 %v2151_v53 }
  0xa6   : > { %757 = vmatpush.msra.mxu3 %v2154_v55 }
  0xa8   : > { %758 = vmatpush.msra.mxu3 %v2157_v61 }
  0xaa   : > { %759 = vmatpush.msra.mxu3 %v2159_v63 }
  0xac   : > { %760 = vmatpush.msra.mxu3 %v2162_v3 }
  0xae   : > { %761 = vmatpush.msra.mxu3 %v2168_v9 }
  0xb0   : > { %830 = vmatpush.msrb.mxu3 %v2121_v35 }
  0xb2   : > { %831 = vmatpush.msrb.mxu3 %v2124_v36 }
  0xb4   : > { %832 = vmatpush.msrb.mxu3 %v2127_v38 }
  0xb6   : > { %833 = vmatpush.msrb.mxu3 %v2130_v39 }
  0xb8   : > { %834 = vmatpush.msrb.mxu3 %v2133_v43 }
  0xba   : > { %835 = vmatpush.msrb.mxu3 %v2136_v44 }
  0xbc   : > { %836 = vmatpush.msrb.mxu3 %v2139_v46 }
  0xbe   : > { %837 = vmatpush.msrb.mxu3 %v2142_v47 }
  0xc0   : > { %838 = vmatpush.msrb.mxu3 %v2145_v50 }
  0xc2   : > { %839 = vmatpush.msrb.mxu3 %v2148_v51 }
  0xc4   : > { %840 = vmatpush.msrb.mxu3 %v2151_v53 }
  0xc6   : > { %841 = vmatpush.msrb.mxu3 %v2154_v55 }
  0xc8   : > { %842 = vmatpush.msrb.mxu3 %v2157_v61 }
  0xca   : > { %843 = vmatpush.msrb.mxu3 %v2159_v63 }
  0xcc   : > { %844 = vmatpush.msrb.mxu3 %v2162_v3 }
  0xce   : > { %845 = vmatpush.msrb.mxu3 %v2168_v9 }
  0xdb   : > { %v572_v27 = vpop.f32.mrf.mxu0 }
  0xdc   : > { %v613_v28 = vpop.f32.mrf.mxu1 }
  0xdd   : > { %v614_v0 = vadd.f32 %v613_v28, %v572_v27 }
  0xe0   : > { %v654_v29 = vpop.f32.mrf.mxu2 }
  0xe1   : > { %v655_v10 = vadd.f32 %v654_v29, %v614_v0 }
  0xe3   : > { %v575_v30 = vpop.f32.mrf.mxu0  ;;  %v2183_v19 = vadd.f32 %v1621_v4, %v655_v10 }
  0xe4   : > { %v616_v31 = vpop.f32.mrf.mxu1 }
  0xe5   : > { %v617_v56 = vadd.f32 %v616_v31, %v575_v30 }
  0xe8   : > { %v657_v32 = vpop.f32.mrf.mxu2 }
  0xe9   : > { %v658_v5 = vadd.f32 %v657_v32, %v617_v56 }
  0xeb   : > { %v578_v33 = vpop.f32.mrf.mxu0  ;;  %v2173_v13 = vadd.f32 %v1621_v4, %v658_v5 }
  0xec   : > { %v619_v34 = vpop.f32.mrf.mxu1 }
  0xed   : > { %v620_v57 = vadd.f32 %v619_v34, %v578_v33  ;;  %v707_v22 = vadd.f32 %v2173_v13, %v2183_v19 }
  0xef   : > { %v708_v26 = vrot.slane %v707_v22, 4 }
  0xf0   : > { %v660_v37 = vpop.f32.mrf.mxu2 }
  0xf1   : > { %v661_v6 = vadd.f32 %v660_v37, %v620_v57  ;;  %v709_v33 = vadd.f32 %v708_v26, %v707_v22  ;;  %v975_v22 = vld [vmem:[#allocation7 + $0x78] sm:$0xff]  ;;  %v990_v26 = vld [vmem:[#allocation7 + $0xf0] sm:$0xff] }
  0xf2   : > { %1008 = vmatpush.msrb.mxu0 %v975_v22 }
  0xf3   : > { %v581_v40 = vpop.f32.mrf.mxu0  ;;  %v2175_v14 = vadd.f32 %v1621_v4, %v661_v6 }
  0xf4   : > { %v622_v42 = vpop.f32.mrf.mxu1 }
  0xf5   : > { %v623_v54 = vadd.f32 %v622_v42, %v581_v40 }
  0xf8   : > { %v663_v45 = vpop.f32.mrf.mxu2 }
  0xf9   : > { %v664_v1 = vadd.f32 %v663_v45, %v623_v54 }
  0xfb   : > { %v584_v48 = vpop.f32.mrf.mxu0  ;;  %v2170_v11 = vadd.f32 %v1621_v4, %v664_v1 }
  0xfc   : > { %v625_v49 = vpop.f32.mrf.mxu1 }
  0xfd   : > { %v626_v62 = vadd.f32 %v625_v49, %v584_v48  ;;  %v714_v20 = vadd.f32 %v2170_v11, %v2175_v14  ;;  %v710_v48 = vrot.slane %v709_v33, 2 }
  0xff   : > { %v715_v24 = vrot.slane %v714_v20, 4 }
 0x100   : > { %v666_v52 = vpop.f32.mrf.mxu2 }
 0x101   : > { %v667_v7 = vadd.f32 %v666_v52, %v626_v62  ;;  %v716_v30 = vadd.f32 %v715_v24, %v714_v20  ;;  %v1006_v24 = vld [vmem:[#allocation7 + $0x170] sm:$0xff] }
 0x103   : > { %v587_v58 = vpop.f32.mrf.mxu0  ;;  %v2180_v18 = vadd.f32 %v1621_v4, %v667_v7  ;;  %v717_v40 = vrot.slane %v716_v30, 2 }
 0x104   : > { %v628_v59 = vpop.f32.mrf.mxu1 }
 0x105   : > { %v629_v2 = vadd.f32 %v628_v59, %v587_v58  ;;  %v718_v54 = vadd.f32 %v717_v40, %v716_v30  ;;  %v711_v58 = vadd.f32 %v710_v48, %v709_v33  ;;  %v1004_v30 = vld [vmem:[#allocation7 + $0x160] sm:$0xff] }
 0x107   : > { %v719_v62 = vrot.slane %v718_v54, 1 }
 0x108   : > { %v669_v8 = vpop.f32.mrf.mxu2 }
 0x109   : > { %v670_v12 = vadd.f32 %v669_v8, %v629_v2  ;;  %v712_v2 = vrot.slane %v711_v58, 1  ;;  %v720_v5 = vadd.f32 %v719_v62, %v718_v54  ;;  %v987_v54 = vld [vmem:[#allocation7 + $0xd8] sm:$0xff] }
 0x10b   : > { %v2177_v15 = vadd.f32 %v1621_v4, %v670_v12  ;;  %v590_v16 = vpop.f32.mrf.mxu0  ;;  %v713_v8 = vadd.f32 %v712_v2, %v711_v58  ;;  %v986_v2 = vld [vmem:[#allocation7 + $0xd0] sm:$0xff] }
 0x10c   : > { %v631_v17 = vpop.f32.mrf.mxu1 }
 0x10d   : > { %v721_v21 = vadd.f32 %v2177_v15, %v2180_v18  ;;  %v632_v27 = vadd.f32 %v631_v17, %v590_v16  ;;  %v740_v16 = vsel %vm739_vm4, %v720_v5, %v713_v8 }
 0x10f   : > { %v722_v25 = vrot.slane %v721_v21, 4 }
 0x110   : > { %v672_v23 = vpop.f32.mrf.mxu2 }
 0x111   : > { %v723_v32 = vadd.f32 %v722_v25, %v721_v21  ;;  %v673_v34 = vadd.f32 %v672_v23, %v632_v27  ;;  %v1007_v21 = vld [vmem:[#allocation7 + $0x178] sm:$0xff]  ;;  %v974_v25 = vld [vmem:[#allocation7 + $0x70] sm:$0xff]  ;;  %v1005_v27 = vld [vmem:[#allocation7 + $0x168] sm:$0xff] }
 0x112   : > { %v991_v23 = vld [vmem:[#allocation7 + $0xf8] sm:$0xff]  ;;  %1090 = vmatpush.msrb.mxu2 %v1007_v21  ;;  %1009 = vmatpush.msrb.mxu0 %v974_v25 }
 0x113   : > { %v593_v28 = vpop.f32.mrf.mxu0  ;;  %v724_v45 = vrot.slane %v723_v32, 2  ;;  %v2198_v49 = vadd.f32 %v1621_v4, %v673_v34  ;;  %1049 = vmatpush.msrb.mxu1 %v991_v23  ;;  %v1003_v34 = vld [vmem:[#allocation7 + $0x158] sm:$0xff] }
 0x114   : > { %v634_v29 = vpop.f32.mrf.mxu1  ;;  %1091 = vmatpush.msrb.mxu2 %v1006_v24 }
 0x115   : > { %v635_v31 = vadd.f32 %v634_v29, %v593_v28  ;;  %v725_v57 = vadd.f32 %v724_v45, %v723_v32  ;;  %v973_v28 = vld [vmem:[#allocation7 + $0x68] sm:$0xff]  ;;  %1050 = vmatpush.msrb.mxu1 %v990_v26  ;;  %v988_v32 = vld [vmem:[#allocation7 + $0xe0] sm:$0xff] }
 0x116   : > { %v989_v29 = vld [vmem:[#allocation7 + $0xe8] sm:$0xff]  ;;  %1092 = vmatpush.msrb.mxu2 %v1005_v27  ;;  %1010 = vmatpush.msrb.mxu0 %v973_v28 }
 0x117   : > { %v726_v1 = vrot.slane %v725_v57, 1  ;;  %1051 = vmatpush.msrb.mxu1 %v989_v29 }
 0x118   : > { %v675_v37 = vpop.f32.mrf.mxu2  ;;  %1093 = vmatpush.msrb.mxu2 %v1004_v30 }
 0x119   : > { %v676_v42 = vadd.f32 %v675_v37, %v635_v31  ;;  %v727_v7 = vadd.f32 %v726_v1, %v725_v57  ;;  %v972_v31 = vld [vmem:[#allocation7 + $0x60] sm:$0xff]  ;;  %v971_v37 = vld [vmem:[#allocation7 + $0x58] sm:$0xff]  ;;  %1052 = vmatpush.msrb.mxu1 %v988_v32 }
 0x11a   : > { %1011 = vmatpush.msrb.mxu0 %v972_v31  ;;  %1094 = vmatpush.msrb.mxu2 %v1003_v34 }
 0x11b   : > { %v2200_v52 = vadd.f32 %v1621_v4, %v676_v42  ;;  %v742_v17 = vsel %vm741_vm5, %v727_v7, %v740_v16  ;;  %1053 = vmatpush.msrb.mxu1 %v987_v54  ;;  %v1001_v7 = vld [vmem:[#allocation7 + $0x148] sm:$0xff] }
 0x11c   : > { %1012 = vmatpush.msrb.mxu0 %v971_v37 }
 0x11d   : > { %v728_v56 = vadd.f32 %v2200_v52, %v2198_v49  ;;  %1054 = vmatpush.msrb.mxu1 %v986_v2 }
 0x11f   : > { %v729_v59 = vrot.slane %v728_v56, 4 }
 0x121   : > { %v730_v0 = vadd.f32 %v729_v59, %v728_v56  ;;  %v1002_v56 = vld [vmem:[#allocation7 + $0x150] sm:$0xff] }
 0x122   : > { %1095 = vmatpush.msrb.mxu2 %v1002_v56 }
 0x123   : > { %v731_v4 = vrot.slane %v730_v0, 2 }
 0x124   : > { %1096 = vmatpush.msrb.mxu2 %v1001_v7 }
 0x125   : > { %v732_v6 = vadd.f32 %v731_v4, %v730_v0  ;;  %v970_v0 = vld [vmem:[#allocation7 + $0x50] sm:$0xff] }
 0x126   : > { %1013 = vmatpush.msrb.mxu0 %v970_v0 }
 0x127   : > { %v733_v10 = vrot.slane %v732_v6, 1 }
 0x129   : > { %v734_v12 = vadd.f32 %v733_v10, %v732_v6 }
 0x12b   : > { %v744_v20 = vsel %vm743_vm6, %v734_v12, %v742_v17 }
 0x12c   : > { %762 = vmatmul.f32.vlgmr.msra.gmra.mxu3 %v744_v20 }
 0x12d   : > { %1180 = vmatpush.msra.mxu3 %v2121_v35 }
 0x12f   : > { %1181 = vmatpush.msra.mxu3 %v2124_v36 }
 0x131   : > { %1182 = vmatpush.msra.mxu3 %v2127_v38 }
 0x133   : > { %1183 = vmatpush.msra.mxu3 %v2130_v39 }
 0x135   : > { %1184 = vmatpush.msra.mxu3 %v2133_v43 }
 0x137   : > { %1185 = vmatpush.msra.mxu3 %v2136_v44 }
 0x139   : > { %1186 = vmatpush.msra.mxu3 %v2139_v46 }
 0x13b   : > { %1187 = vmatpush.msra.mxu3 %v2142_v47 }
 0x13d   : > { %1188 = vmatpush.msra.mxu3 %v2145_v50 }
 0x13f   : > { %1189 = vmatpush.msra.mxu3 %v2148_v51 }
 0x141   : > { %1190 = vmatpush.msra.mxu3 %v2151_v53 }
 0x143   : > { %1191 = vmatpush.msra.mxu3 %v2154_v55 }
 0x145   : > { %1192 = vmatpush.msra.mxu3 %v2157_v61 }
 0x147   : > { %1193 = vmatpush.msra.mxu3 %v2159_v63 }
 0x149   : > { %1194 = vmatpush.msra.mxu3 %v2162_v3 }
 0x14b   : > { %1195 = vmatpush.msra.mxu3 %v2168_v9 }
 0x1af   : > { %v763_v33 = vpop.f32.mrf.mxu3 }
 0x1b0   : > { %v767_v40 = vrot.slane %v763_v33, 1  ;;  %v768_v42 = vrot.slane %v763_v33, 2  ;;  %v769_v45 = vrot.slane %v763_v33, 3  ;;  %v770_v48 = vperm.slane %v763_v33, 0 }
 0x1b2   : > { %v771_v57 = vperm.slane %v767_v40, 0  ;;  %v772_v58 = vperm.slane %v768_v42, 0  ;;  %v773_v59 = vperm.slane %v769_v45, 0  ;;  %v2232_v62 = vsub.f32 %v2183_v19, %v770_v48 }
 0x1b3   : > { %v2235_v1 = vsub.f32 %v2173_v13, %v770_v48 }
 0x1b4   : > { %v2238_v4 = vsub.f32 %v2175_v14, %v771_v57  ;;  %v2241_v5 = vsub.f32 %v2170_v11, %v771_v57  ;;  %v2244_v6 = vsub.f32 %v2180_v18, %v772_v58  ;;  %v2247_v19 = vsub.f32 %v2177_v15, %v772_v58 }
 0x1b5   : > { %v2250_v8 = vsub.f32 %v2198_v49, %v773_v59  ;;  %v2253_v13 = vsub.f32 %v2200_v52, %v773_v59  ;;  %v786_v14 = vmul.f32 %v2232_v62, %v2232_v62  ;;  %v787_v11 = vmul.f32 %v2235_v1, %v2235_v1 }
 0x1b6   : > { %v788_v18 = vmul.f32 %v2238_v4, %v2238_v4  ;;  %v789_v15 = vmul.f32 %v2241_v5, %v2241_v5  ;;  %v790_v49 = vmul.f32 %v2244_v6, %v2244_v6  ;;  %v791_v52 = vmul.f32 %v2247_v19, %v2247_v19 }
 0x1b7   : > { %v792_v10 = vmul.f32 %v2250_v8, %v2250_v8  ;;  %v793_v12 = vmul.f32 %v2253_v13, %v2253_v13  ;;  %v794_v16 = vadd.f32 %v787_v11, %v786_v14  ;;  %v964_v11 = vld [vmem:[#allocation7 + $0x20] sm:$0xff] }
 0x1b8   : > { %v801_v17 = vadd.f32 %v789_v15, %v788_v18  ;;  %v808_v20 = vadd.f32 %v791_v52, %v790_v49  ;;  %v995_v18 = vld [vmem:[#allocation7 + $0x118] sm:$0xff]  ;;  %v978_v49 = vld [vmem:[#allocation7 + $0x90] sm:$0xff] }
 0x1b9   : > { %v795_v21 = vrot.slane %v794_v16, 4  ;;  %v815_v22 = vadd.f32 %v793_v12, %v792_v10  ;;  %v979_v15 = vld [vmem:[#allocation7 + $0x98] sm:$0xff]  ;;  %v994_v10 = vld [vmem:[#allocation7 + $0x110] sm:$0xff]  ;;  %v977_v12 = vld [vmem:[#allocation7 + $0x88] sm:$0xff] }
 0x1ba   : > { %v802_v23 = vrot.slane %v801_v17, 4  ;;  %v809_v24 = vrot.slane %v808_v20, 4  ;;  %v963_v52 = vld [vmem:[#allocation7 + $0x18] sm:$0xff] }
 0x1bb   : > { %v796_v25 = vadd.f32 %v795_v21, %v794_v16  ;;  %v816_v26 = vrot.slane %v815_v22, 4  ;;  %v962_v16 = vld [vmem:[#allocation7 + $0x10] sm:$0xff]  ;;  %v976_v21 = vld [vmem:[#allocation7 + $0x80] sm:$0xff] }
 0x1bc   : > { %v803_v27 = vadd.f32 %v802_v23, %v801_v17  ;;  %v810_v28 = vadd.f32 %v809_v24, %v808_v20  ;;  %v993_v17 = vld [vmem:[#allocation7 + $0x108] sm:$0xff]  ;;  %v992_v24 = vld [vmem:[#allocation7 + $0x100] sm:$0xff] }
 0x1bd   : > { %v797_v29 = vrot.slane %v796_v25, 2  ;;  %v817_v30 = vadd.f32 %v816_v26, %v815_v22  ;;  %v961_v23 = vld [vmem:[#allocation7 + $0x8] sm:$0xff] }
 0x1be   : > { %v804_v31 = vrot.slane %v803_v27, 2  ;;  %v811_v32 = vrot.slane %v810_v28, 2 }
 0x1bf   : > { %v798_v33 = vadd.f32 %v797_v29, %v796_v25  ;;  %v818_v34 = vrot.slane %v817_v30, 2  ;;  %v960_v25 = vld [vmem:[#allocation7] sm:$0xff] }
 0x1c0   : > { %v805_v37 = vadd.f32 %v804_v31, %v803_v27  ;;  %v812_v40 = vadd.f32 %v811_v32, %v810_v28  ;;  %v1622_v31 = vld [vmem:[%s2471_s3] ss:$0 sm:$0xff] }
 0x1c1   : > { %v799_v42 = vrot.slane %v798_v33, 1  ;;  %v819_v45 = vadd.f32 %v818_v34, %v817_v30 }
 0x1c2   : > { %v806_v48 = vrot.slane %v805_v37, 1  ;;  %v813_v54 = vrot.slane %v812_v40, 1 }
 0x1c3   : > { %v820_v56 = vrot.slane %v819_v45, 1  ;;  %v800_v57 = vadd.f32 %v799_v42, %v798_v33  ;;  %v1623_v42 = vld [vmem:[%s2472_s4] ss:$0 sm:$0xff] }
 0x1c4   : > { %v807_v58 = vadd.f32 %v806_v48, %v805_v37  ;;  %v814_v59 = vadd.f32 %v813_v54, %v812_v40 }
 0x1c5   : > { %v821_v0 = vadd.f32 %v820_v56, %v819_v45 }
 0x1c6   : > { %v826_v2 = vsel %vm739_vm4, %v807_v58, %v800_v57 }
 0x1c7   : > { %v827_v7 = vsel %vm741_vm5, %v814_v59, %v826_v2 }
 0x1c8   : > { %v828_v14 = vsel %vm743_vm6, %v821_v0, %v827_v7 }
 0x1c9   : > { %846 = vmatmul.f32.vlgmr.msrb.gmra.mxu3 %v828_v14 }
 0x1ca   : > { %1264 = vmatpush.msrb.mxu3 %v2121_v35  ;;  %v985_v35 = vld [vmem:[#allocation7 + $0xc8] sm:$0xff] }
 0x1cb   : > { %1055 = vmatpush.msrb.mxu1 %v985_v35 }
 0x1cc   : > { %1265 = vmatpush.msrb.mxu3 %v2124_v36  ;;  %v984_v36 = vld [vmem:[#allocation7 + $0xc0] sm:$0xff] }
 0x1cd   : > { %1056 = vmatpush.msrb.mxu1 %v984_v36 }
 0x1ce   : > { %1266 = vmatpush.msrb.mxu3 %v2127_v38  ;;  %v983_v38 = vld [vmem:[#allocation7 + $0xb8] sm:$0xff] }
 0x1cf   : > { %1057 = vmatpush.msrb.mxu1 %v983_v38 }
 0x1d0   : > { %1267 = vmatpush.msrb.mxu3 %v2130_v39  ;;  %v969_v39 = vld [vmem:[#allocation7 + $0x48] sm:$0xff] }
 0x1d1   : > { %1014 = vmatpush.msrb.mxu0 %v969_v39 }
 0x1d2   : > { %1268 = vmatpush.msrb.mxu3 %v2133_v43  ;;  %v1000_v43 = vld [vmem:[#allocation7 + $0x140] sm:$0xff] }
 0x1d3   : > { %1097 = vmatpush.msrb.mxu2 %v1000_v43 }
 0x1d4   : > { %1269 = vmatpush.msrb.mxu3 %v2136_v44  ;;  %v982_v44 = vld [vmem:[#allocation7 + $0xb0] sm:$0xff] }
 0x1d5   : > { %1058 = vmatpush.msrb.mxu1 %v982_v44 }
 0x1d6   : > { %1270 = vmatpush.msrb.mxu3 %v2139_v46  ;;  %v968_v46 = vld [vmem:[#allocation7 + $0x40] sm:$0xff] }
 0x1d7   : > { %1015 = vmatpush.msrb.mxu0 %v968_v46 }
 0x1d8   : > { %1271 = vmatpush.msrb.mxu3 %v2142_v47  ;;  %v999_v47 = vld [vmem:[#allocation7 + $0x138] sm:$0xff] }
 0x1d9   : > { %1098 = vmatpush.msrb.mxu2 %v999_v47 }
 0x1da   : > { %1272 = vmatpush.msrb.mxu3 %v2145_v50  ;;  %v981_v50 = vld [vmem:[#allocation7 + $0xa8] sm:$0xff] }
 0x1db   : > { %1059 = vmatpush.msrb.mxu1 %v981_v50 }
 0x1dc   : > { %1273 = vmatpush.msrb.mxu3 %v2148_v51  ;;  %v967_v51 = vld [vmem:[#allocation7 + $0x38] sm:$0xff] }
 0x1dd   : > { %1016 = vmatpush.msrb.mxu0 %v967_v51 }
 0x1de   : > { %1274 = vmatpush.msrb.mxu3 %v2151_v53  ;;  %v998_v53 = vld [vmem:[#allocation7 + $0x130] sm:$0xff] }
 0x1df   : > { %1099 = vmatpush.msrb.mxu2 %v998_v53 }
 0x1e0   : > { %1275 = vmatpush.msrb.mxu3 %v2154_v55  ;;  %v980_v55 = vld [vmem:[#allocation7 + $0xa0] sm:$0xff] }
 0x1e1   : > { %1060 = vmatpush.msrb.mxu1 %v980_v55 }
 0x1e2   : > { %1276 = vmatpush.msrb.mxu3 %v2157_v61  ;;  %v966_v61 = vld [vmem:[#allocation7 + $0x30] sm:$0xff] }
 0x1e3   : > { %1017 = vmatpush.msrb.mxu0 %v966_v61  ;;  %1061 = vmatpush.msrb.mxu1 %v979_v15 }
 0x1e4   : > { %1277 = vmatpush.msrb.mxu3 %v2159_v63  ;;  %v997_v63 = vld [vmem:[#allocation7 + $0x128] sm:$0xff] }
 0x1e5   : > { %1100 = vmatpush.msrb.mxu2 %v997_v63  ;;  %1062 = vmatpush.msrb.mxu1 %v978_v49 }
 0x1e6   : > { %1278 = vmatpush.msrb.mxu3 %v2162_v3  ;;  %v965_v3 = vld [vmem:[#allocation7 + $0x28] sm:$0xff] }
 0x1e7   : > { %1018 = vmatpush.msrb.mxu0 %v965_v3  ;;  %1063 = vmatpush.msrb.mxu1 %v977_v12 }
 0x1e8   : > { %1279 = vmatpush.msrb.mxu3 %v2168_v9  ;;  %v996_v9 = vld [vmem:[#allocation7 + $0x120] sm:$0xff] }
 0x1e9   : > { %1101 = vmatpush.msrb.mxu2 %v996_v9  ;;  %1019 = vmatpush.msrb.mxu0 %v964_v11 }
 0x1ea   : > { %1064 = vmatpush.msrb.mxu1 %v976_v21 }
 0x1eb   : > { %1102 = vmatpush.msrb.mxu2 %v995_v18  ;;  %1020 = vmatpush.msrb.mxu0 %v963_v52 }
 0x1ed   : > { %1103 = vmatpush.msrb.mxu2 %v994_v10  ;;  %1021 = vmatpush.msrb.mxu0 %v962_v16 }
 0x1ef   : > { %1104 = vmatpush.msrb.mxu2 %v993_v17  ;;  %1022 = vmatpush.msrb.mxu0 %v961_v23 }
 0x1f1   : > { %1105 = vmatpush.msrb.mxu2 %v992_v24  ;;  %1023 = vmatpush.msrb.mxu0 %v960_v25 }
 0x24c   : > { %v847_v20 = vpop.f32.mrf.mxu3 }
 0x24d   : > { %v848_v22 = vadd.f32 1e-05, %v847_v20 }
 0x24f   : > { %1627 = vrsqrt.f32 %v848_v22  ;;  %vm856_vm8 = vweird.f32 %v848_v22 }
 0x255   : > { %v1628_v26 = vpop.eup %1627 }
 0x256   : > { %v851_v27 = vmul.f32 %v1628_v26, %v848_v22  ;;  %vm857_vm7 = vweird.f32 %v1628_v26 }
 0x257   : > { %vm858_vm9 = vmor %vm856_vm8, %vm857_vm7 }
 0x258   : > { %v852_v28 = vmul.f32 %v1628_v26, %v851_v27 }
 0x25a   : > { %v853_v29 = vmul.f32 0.5, %v852_v28 }
 0x25c   : > { %v854_v30 = vsub.f32 1.5, %v853_v29 }
 0x25e   : > { %v855_v32 = vmul.f32 %v1628_v26, %v854_v30 }
 0x260   : > { %v859_v33 = vsel %vm858_vm9, %v1628_v26, %v855_v32 }
 0x261   : > { %v863_v34 = vmul.f32 %v1622_v31, %v859_v33 }
 0x263   : > { %v867_v37 = vrot.slane %v863_v34, 3  ;;  %v868_v40 = vperm.slane %v863_v34, 0  ;;  %v865_v45 = vrot.slane %v863_v34, 1  ;;  %v866_v39 = vrot.slane %v863_v34, 2 }
 0x265   : > { %v871_v48 = vperm.slane %v867_v37, 0  ;;  %v876_v54 = vmul.f32 %v868_v40, %v2232_v62  ;;  %v877_v56 = vmul.f32 %v868_v40, %v2235_v1  ;;  %v869_v57 = vperm.slane %v865_v45, 0 }
 0x266   : > { %v870_v50 = vperm.slane %v866_v39, 0 }
 0x267   : > { %v887_v58 = vadd.f32 %v1623_v42, %v876_v54  ;;  %v888_v59 = vadd.f32 %v1623_v42, %v877_v56  ;;  %v883_v0 = vmul.f32 %v871_v48, %v2253_v13  ;;  %v878_v2 = vmul.f32 %v869_v57, %v2238_v4 }
 0x268   : > { %v879_v38 = vmul.f32 %v869_v57, %v2241_v5  ;;  %v880_v9 = vmul.f32 %v870_v50, %v2244_v6  ;;  %v881_v16 = vmul.f32 %v870_v50, %v2247_v19  ;;  %v882_v25 = vmul.f32 %v871_v48, %v2250_v8 }
 0x269   : > { %v895_v7 = vmul.f32 0.01, %v887_v58  ;;  %v896_v14 = vmul.f32 0.01, %v888_v59  ;;  %v894_v35 = vadd.f32 %v1623_v42, %v883_v0  ;;  %v889_v36 = vadd.f32 %v1623_v42, %v878_v2 }
 0x26a   : > { %v890_v4 = vadd.f32 %v1623_v42, %v879_v38  ;;  %v891_v49 = vadd.f32 %v1623_v42, %v880_v9  ;;  %v892_v21 = vadd.f32 %v1623_v42, %v881_v16  ;;  %v893_v28 = vadd.f32 %v1623_v42, %v882_v25 }
 0x26b   : > { %v2301_v43 = vmax.f32 %v887_v58, %v895_v7  ;;  %v904_v44 = vmax.f32 %v888_v59, %v896_v14  ;;  %v902_v62 = vmul.f32 0.01, %v894_v35  ;;  %v897_v46 = vmul.f32 0.01, %v889_v36 }
 0x26c   : > { %v898_v3 = vmul.f32 0.01, %v890_v4  ;;  %v899_v12 = vmul.f32 0.01, %v891_v49  ;;  %v900_v24 = vmul.f32 0.01, %v892_v21 }
 0x26d   : > { %1065 = vmatmul.f32.vlgmr.msrb.gmra.mxu1 %v2301_v43  ;;  %v928_v1 = vrot.slane %v2301_v43, 1  ;;  %v929_v47 = vrot.slane %v904_v44, 1  ;;  %v2305_v13 = vmax.f32 %v894_v35, %v902_v62  ;;  %v912_v51 = vrot.slane %v2301_v43, 7 }
 0x26e   : > { %v905_v55 = vmax.f32 %v889_v36, %v897_v46  ;;  %v913_v11 = vrot.slane %v904_v44, 7  ;;  %v906_v15 = vmax.f32 %v890_v4, %v898_v3  ;;  %v907_v20 = vmax.f32 %v891_v49, %v899_v12 }
 0x26f   : > { %v942_v5 = vsel %vm474_vm0, %v928_v1, %v929_v47  ;;  %v919_v53 = vrot.slane %v2305_v13, 7  ;;  %v908_v27 = vmax.f32 %v892_v21, %v900_v24  ;;  %v901_v31 = vmul.f32 0.01, %v893_v28 }
 0x270   : > { %1106 = vmatmul.f32.vlgmr.msrb.gmra.mxu2 %v942_v5  ;;  %v930_v63 = vrot.slane %v905_v55, 1  ;;  %v926_v52 = vsel %vm457_vm1, %v912_v51, %v913_v11  ;;  %v931_v10 = vrot.slane %v906_v15, 1  ;;  %v914_v6 = vrot.slane %v905_v55, 7 }
 0x271   : > { %v927_v61 = vsel %vm457_vm1, %v919_v53, %v912_v51  ;;  %v932_v23 = vrot.slane %v907_v20, 1  ;;  %v915_v19 = vrot.slane %v906_v15, 7  ;;  %v933_v30 = vrot.slane %v908_v27, 1 }
 0x272   : > { %1513 = vmatmul.msk.f32.vlgmr.msrb.gmra.mxu0 %vm1538_vm2, %v927_v61  ;;  %v941_v18 = vsel %vm474_vm0, %v929_v47, %v930_v63  ;;  %v940_v17 = vsel %vm474_vm0, %v930_v63, %v931_v10  ;;  %v925_v22 = vsel %vm457_vm1, %v913_v11, %v914_v6  ;;  %v916_v32 = vrot.slane %v907_v20, 7  ;;  %v1624_v61 = vld [vmem:[%s2474_s6] ss:$0 sm:$0xff] }
 0x273   : > { %v939_v26 = vsel %vm474_vm0, %v931_v10, %v932_v23  ;;  %v924_v29 = vsel %vm457_vm1, %v914_v6, %v915_v19  ;;  %v938_v8 = vsel %vm474_vm0, %v932_v23, %v933_v30  ;;  %v909_v33 = vmax.f32 %v893_v28, %v901_v31 }
 0x274   : > { %v923_v34 = vsel %vm457_vm1, %v915_v19, %v916_v32  ;;  %v917_v40 = vrot.slane %v908_v27, 7  ;;  %v935_v48 = vrot.slane %v2305_v13, 1 }
 0x275   : > { %1068 = vmatmul.f32.gmra.mxu1 %v904_v44  ;;  %v934_v37 = vrot.slane %v909_v33, 1  ;;  %v918_v54 = vrot.slane %v909_v33, 7 }
 0x276   : > { %v922_v45 = vsel %vm457_vm1, %v916_v32, %v917_v40  ;;  %v943_v58 = vsel %vm474_vm0, %v935_v48, %v928_v1 }
 0x277   : > { %v937_v42 = vsel %vm474_vm0, %v933_v30, %v934_v37  ;;  %v936_v56 = vsel %vm474_vm0, %v934_v37, %v935_v48  ;;  %v921_v57 = vsel %vm457_vm1, %v917_v40, %v918_v54  ;;  %v920_v59 = vsel %vm457_vm1, %v918_v54, %v919_v53 }
 0x278   : > { %1521 = vmatmul.msk.f32.gmra.mxu2 %vm1539_vm3, %v941_v18 }
 0x27a   : > { %1027 = vmatmul.f32.gmra.mxu0 %v926_v52 }
 0x27d   : > { %1071 = vmatmul.f32.gmra.mxu1 %v905_v55 }
 0x280   : > { %1112 = vmatmul.f32.gmra.mxu2 %v940_v17 }
 0x282   : > { %1515 = vmatmul.msk.f32.gmra.mxu0 %vm1538_vm2, %v925_v22 }
 0x285   : > { %1074 = vmatmul.f32.gmra.mxu1 %v906_v15 }
 0x288   : > { %1523 = vmatmul.msk.f32.gmra.mxu2 %vm1539_vm3, %v939_v26 }
 0x28a   : > { %1033 = vmatmul.f32.gmra.mxu0 %v924_v29 }
 0x28d   : > { %1077 = vmatmul.f32.gmra.mxu1 %v907_v20 }
 0x290   : > { %1118 = vmatmul.f32.gmra.mxu2 %v938_v8 }
 0x292   : > { %1517 = vmatmul.msk.f32.gmra.mxu0 %vm1538_vm2, %v923_v34 }
 0x295   : > { %1080 = vmatmul.f32.gmra.mxu1 %v908_v27 }
 0x298   : > { %1525 = vmatmul.msk.f32.gmra.mxu2 %vm1539_vm3, %v937_v42 }
 0x29a   : > { %1039 = vmatmul.f32.gmra.mxu0 %v922_v45 }
 0x29d   : > { %1083 = vmatmul.f32.gmra.mxu1 %v909_v33 }
 0x2a0   : > { %1124 = vmatmul.f32.gmra.mxu2 %v936_v56 }
 0x2a2   : > { %1519 = vmatmul.msk.f32.gmra.mxu0 %vm1538_vm2, %v921_v57 }
 0x2a5   : > { %1086 = vmatmul.f32.gmra.mxu1 %v2305_v13 }
 0x2a8   : > { %1527 = vmatmul.msk.f32.gmra.mxu2 %vm1539_vm3, %v943_v58 }
 0x2aa   : > { %1045 = vmatmul.f32.gmra.mxu0 %v920_v59 }
 0x2ea   : > { %v1066_v0 = vpop.f32.mrf.mxu1 }
 0x2ef   : > { %v1025_v2 = vpop.f32.mrf.mxu0 }
 0x2f0   : > { %v1067_v55 = vadd.f32 %v1066_v0, %v1025_v2 }
 0x2f2   : > { %v1069_v7 = vpop.f32.mrf.mxu1 }
 0x2f3   : > { %v1107_v14 = vpop.f32.mrf.mxu2 }
 0x2f4   : > { %v1108_v15 = vadd.f32 %v1107_v14, %v1067_v55 }
 0x2f6   : > { %v1134_v21 = vadd.f32 %v1624_v61, %v1108_v15 }
 0x2f7   : > { %v1028_v35 = vpop.f32.mrf.mxu0 }
 0x2f8   : > { %v1070_v50 = vadd.f32 %v1069_v7, %v1028_v35 }
 0x2fa   : > { %v1072_v36 = vpop.f32.mrf.mxu1 }
 0x2fb   : > { %v1110_v38 = vpop.f32.mrf.mxu2 }
 0x2fc   : > { %v1111_v63 = vadd.f32 %v1110_v38, %v1070_v50 }
 0x2fe   : > { %v1135_v10 = vadd.f32 %v1624_v61, %v1111_v63 }
 0x2ff   : > { %v1031_v39 = vpop.f32.mrf.mxu0 }
 0x300   : > { %v1073_v5 = vadd.f32 %v1072_v36, %v1031_v39  ;;  %v1144_v24 = vadd.f32 %v1135_v10, %v1134_v21 }
 0x302   : > { %v1075_v43 = vpop.f32.mrf.mxu1  ;;  %v1145_v27 = vrot.slane %v1144_v24, 4 }
 0x303   : > { %v1113_v44 = vpop.f32.mrf.mxu2 }
 0x304   : > { %v1114_v3 = vadd.f32 %v1113_v44, %v1073_v5  ;;  %v1146_v8 = vadd.f32 %v1145_v27, %v1144_v24 }
 0x306   : > { %v1136_v12 = vadd.f32 %v1624_v61, %v1114_v3  ;;  %v1147_v48 = vrot.slane %v1146_v8, 2 }
 0x307   : > { %v1034_v62 = vpop.f32.mrf.mxu0 }
 0x308   : > { %v1076_v4 = vadd.f32 %v1075_v43, %v1034_v62  ;;  %v1148_v0 = vadd.f32 %v1147_v48, %v1146_v8 }
 0x30a   : > { %v1078_v46 = vpop.f32.mrf.mxu1  ;;  %v1149_v36 = vrot.slane %v1148_v0, 1 }
 0x30b   : > { %v1116_v60 = vpop.f32.mrf.mxu2 }
 0x30c   : > { %v1117_v51 = vadd.f32 %v1116_v60, %v1076_v4  ;;  %v1150_v62 = vadd.f32 %v1149_v36, %v1148_v0 }
 0x30e   : > { %v1137_v49 = vadd.f32 %v1624_v61, %v1117_v51 }
 0x30f   : > { %v1037_v1 = vpop.f32.mrf.mxu0 }
 0x310   : > { %v1079_v53 = vadd.f32 %v1078_v46, %v1037_v1  ;;  %v1151_v22 = vadd.f32 %v1137_v49, %v1136_v12 }
 0x312   : > { %v1081_v13 = vpop.f32.mrf.mxu1  ;;  %v1152_v19 = vrot.slane %v1151_v22, 4 }
 0x313   : > { %v1119_v47 = vpop.f32.mrf.mxu2 }
 0x314   : > { %v1120_v11 = vadd.f32 %v1119_v47, %v1079_v53  ;;  %v1153_v29 = vadd.f32 %v1152_v19, %v1151_v22 }
 0x316   : > { %v1138_v6 = vadd.f32 %v1624_v61, %v1120_v11  ;;  %v1154_v40 = vrot.slane %v1153_v29, 2 }
 0x317   : > { %v1040_v41 = vpop.f32.mrf.mxu0 }
 0x318   : > { %v1082_v9 = vadd.f32 %v1081_v13, %v1040_v41  ;;  %v1155_v57 = vadd.f32 %v1154_v40, %v1153_v29 }
 0x31a   : > { %v1084_v17 = vpop.f32.mrf.mxu1  ;;  %v1156_v7 = vrot.slane %v1155_v57, 1 }
 0x31b   : > { %v1122_v18 = vpop.f32.mrf.mxu2 }
 0x31c   : > { %v1123_v52 = vadd.f32 %v1122_v18, %v1082_v9  ;;  %v1157_v39 = vadd.f32 %v1156_v7, %v1155_v57 }
 0x31e   : > { %v1139_v16 = vadd.f32 %v1624_v61, %v1123_v52  ;;  %v1176_v1 = vsel %vm739_vm4, %v1157_v39, %v1150_v62 }
 0x31f   : > { %v1043_v20 = vpop.f32.mrf.mxu0 }
 0x320   : > { %v1158_v23 = vadd.f32 %v1139_v16, %v1138_v6  ;;  %v1085_v30 = vadd.f32 %v1084_v17, %v1043_v20 }
 0x322   : > { %v1159_v26 = vrot.slane %v1158_v23, 4  ;;  %v1087_v32 = vpop.f32.mrf.mxu1 }
 0x323   : > { %v1125_v25 = vpop.f32.mrf.mxu2 }
 0x324   : > { %v1160_v31 = vadd.f32 %v1159_v26, %v1158_v23  ;;  %v1126_v33 = vadd.f32 %v1125_v25, %v1085_v30 }
 0x326   : > { %v1161_v45 = vrot.slane %v1160_v31, 2  ;;  %v1140_v54 = vadd.f32 %v1624_v61, %v1126_v33 }
 0x327   : > { %v1046_v28 = vpop.f32.mrf.mxu0 }
 0x328   : > { %v1088_v34 = vadd.f32 %v1087_v32, %v1046_v28  ;;  %v1162_v59 = vadd.f32 %v1161_v45, %v1160_v31 }
 0x32a   : > { %v1163_v35 = vrot.slane %v1162_v59, 1 }
 0x32b   : > { %v1128_v37 = vpop.f32.mrf.mxu2 }
 0x32c   : > { %v1129_v42 = vadd.f32 %v1128_v37, %v1088_v34  ;;  %v1164_v44 = vadd.f32 %v1163_v35, %v1162_v59 }
 0x32e   : > { %v1141_v56 = vadd.f32 %v1624_v61, %v1129_v42  ;;  %v1177_v47 = vsel %vm741_vm5, %v1164_v44, %v1176_v1 }
 0x330   : > { %v1165_v58 = vadd.f32 %v1141_v56, %v1140_v54 }
 0x332   : > { %v1166_v2 = vrot.slane %v1165_v58, 4 }
 0x334   : > { %v1167_v14 = vadd.f32 %v1166_v2, %v1165_v58 }
 0x336   : > { %v1168_v38 = vrot.slane %v1167_v14, 2 }
 0x338   : > { %v1169_v43 = vadd.f32 %v1168_v38, %v1167_v14 }
 0x33a   : > { %v1170_v46 = vrot.slane %v1169_v43, 1 }
 0x33c   : > { %v1171_v60 = vadd.f32 %v1170_v46, %v1169_v43 }
 0x33e   : > { %v1178_v13 = vsel %vm743_vm6, %v1171_v60, %v1177_v47  ;;  %v1625_v47 = vld [vmem:[%s2475_s7] ss:$0 sm:$0xff] }
 0x33f   : > { %1196 = vmatmul.f32.vlgmr.msra.gmra.mxu3 %v1178_v13 }
 0x3c2   : > { %v1197_v4 = vpop.f32.mrf.mxu3 }
 0x3c3   : > { %v1201_v41 = vrot.slane %v1197_v4, 1  ;;  %v1202_v50 = vrot.slane %v1197_v4, 2  ;;  %v1203_v5 = vrot.slane %v1197_v4, 3  ;;  %v1204_v51 = vperm.slane %v1197_v4, 0 }
 0x3c5   : > { %v1205_v53 = vperm.slane %v1201_v41, 0  ;;  %v1206_v55 = vperm.slane %v1202_v50, 0  ;;  %v1207_v61 = vperm.slane %v1203_v5, 0  ;;  %v2376_v63 = vsub.f32 %v1134_v21, %v1204_v51 }
 0x3c6   : > { %v2378_v3 = vsub.f32 %v1135_v10, %v1204_v51 }
 0x3c7   : > { %v2380_v9 = vsub.f32 %v1136_v12, %v1205_v53  ;;  %v2382_v11 = vsub.f32 %v1137_v49, %v1205_v53  ;;  %v2384_v18 = vsub.f32 %v1138_v6, %v1206_v55  ;;  %v2386_v15 = vsub.f32 %v1139_v16, %v1206_v55  ;;  %v1626_v55 = vld [vmem:[%s2476_s8] ss:$0 sm:$0xff] }
 0x3c8   : > { %v2388_v52 = vsub.f32 %v1140_v54, %v1207_v61  ;;  %v2390_v17 = vsub.f32 %v1141_v56, %v1207_v61  ;;  %v1220_v20 = vmul.f32 %v2376_v63, %v2376_v63  ;;  %v1221_v21 = vmul.f32 %v2378_v3, %v2378_v3 }
 0x3c9   : > { %v1222_v10 = vmul.f32 %v2380_v9, %v2380_v9  ;;  %v1223_v49 = vmul.f32 %v2382_v11, %v2382_v11  ;;  %v1224_v12 = vmul.f32 %v2384_v18, %v2384_v18  ;;  %v1225_v16 = vmul.f32 %v2386_v15, %v2386_v15 }
 0x3ca   : > { %v1226_v6 = vmul.f32 %v2388_v52, %v2388_v52  ;;  %v1227_v22 = vmul.f32 %v2390_v17, %v2390_v17  ;;  %v1228_v23 = vadd.f32 %v1221_v21, %v1220_v20 }
 0x3cb   : > { %v1235_v24 = vadd.f32 %v1223_v49, %v1222_v10  ;;  %v1242_v25 = vadd.f32 %v1225_v16, %v1224_v12 }
 0x3cc   : > { %v1229_v19 = vrot.slane %v1228_v23, 4  ;;  %v1249_v26 = vadd.f32 %v1227_v22, %v1226_v6 }
 0x3cd   : > { %v1236_v27 = vrot.slane %v1235_v24, 4  ;;  %v1243_v28 = vrot.slane %v1242_v25, 4 }
 0x3ce   : > { %v1230_v29 = vadd.f32 %v1229_v19, %v1228_v23  ;;  %v1250_v30 = vrot.slane %v1249_v26, 4 }
 0x3cf   : > { %v1237_v31 = vadd.f32 %v1236_v27, %v1235_v24  ;;  %v1244_v32 = vadd.f32 %v1243_v28, %v1242_v25  ;;  %v1631_v27 = vld [vmem:[%s2024_s5] sm:$0xff]  ;;  %v1632_v28 = vld [vmem:[%s2024_s5 + $0x8] sm:$0xff] }
 0x3d0   : > { %v1231_v8 = vrot.slane %v1230_v29, 2  ;;  %v1251_v33 = vadd.f32 %v1250_v30, %v1249_v26 }
 0x3d1   : > { %v1238_v34 = vrot.slane %v1237_v31, 2  ;;  %v1245_v37 = vrot.slane %v1244_v32, 2 }
 0x3d2   : > { %v1232_v40 = vadd.f32 %v1231_v8, %v1230_v29  ;;  %v1252_v42 = vrot.slane %v1251_v33, 2  ;;  %v1633_v29 = vld [vmem:[%s2024_s5 + $0x10] sm:$0xff] }
 0x3d3   : > { %v1239_v45 = vadd.f32 %v1238_v34, %v1237_v31  ;;  %v1246_v48 = vadd.f32 %v1245_v37, %v1244_v32  ;;  %v1635_v32 = vld [vmem:[%s2024_s5 + $0x20] sm:$0xff]  ;;  %v1637_v37 = vld [vmem:[%s2024_s5 + $0x30] sm:$0xff] }
 0x3d4   : > { %v1233_v54 = vrot.slane %v1232_v40, 1  ;;  %v1253_v56 = vadd.f32 %v1252_v42, %v1251_v33  ;;  %v1636_v33 = vld [vmem:[%s2024_s5 + $0x28] sm:$0xff]  ;;  %v1638_v42 = vld [vmem:[%s2024_s5 + $0x38] sm:$0xff] }
 0x3d5   : > { %v1240_v57 = vrot.slane %v1239_v45, 1  ;;  %v1247_v58 = vrot.slane %v1246_v48, 1 }
 0x3d6   : > { %v1254_v59 = vrot.slane %v1253_v56, 1  ;;  %v1234_v0 = vadd.f32 %v1233_v54, %v1232_v40 }
 0x3d7   : > { %v1241_v2 = vadd.f32 %v1240_v57, %v1239_v45  ;;  %v1248_v7 = vadd.f32 %v1247_v58, %v1246_v48 }
 0x3d8   : > { %v1255_v14 = vadd.f32 %v1254_v59, %v1253_v56 }
 0x3d9   : > { %v1260_v35 = vsel %vm739_vm4, %v1241_v2, %v1234_v0 }
 0x3da   : > { %v1261_v36 = vsel %vm741_vm5, %v1248_v7, %v1260_v35 }
 0x3db   : > { %v1262_v38 = vsel %vm743_vm6, %v1255_v14, %v1261_v36 }
 0x3dc   : > { %1280 = vmatmul.f32.vlgmr.msrb.gmra.mxu3 %v1262_v38 }
 0x45f   : > { %v1281_v39 = vpop.f32.mrf.mxu3 }
 0x460   : > { %v1282_v43 = vadd.f32 1e-05, %v1281_v39 }
 0x462   : > { %1629 = vrsqrt.f32 %v1282_v43  ;;  %vm1290_vm11 = vweird.f32 %v1282_v43 }
 0x468   : > { %v1630_v44 = vpop.eup %1629 }
 0x469   : > { %v1285_v62 = vmul.f32 %v1630_v44, %v1282_v43  ;;  %vm1291_vm10 = vweird.f32 %v1630_v44 }
 0x46a   : > { %vm1292_vm12 = vmor %vm1290_vm11, %vm1291_vm10 }
 0x46b   : > { %v1286_v46 = vmul.f32 %v1630_v44, %v1285_v62 }
 0x46d   : > { %v1287_v60 = vmul.f32 0.5, %v1286_v46 }
 0x46f   : > { %v1288_v1 = vsub.f32 1.5, %v1287_v60 }
 0x471   : > { %v1289_v13 = vmul.f32 %v1630_v44, %v1288_v1 }
 0x473   : > { %v1293_v4 = vsel %vm1292_vm12, %v1630_v44, %v1289_v13 }
 0x474   : > { %v1297_v41 = vmul.f32 %v1625_v47, %v1293_v4 }
 0x476   : > { %v1299_v50 = vrot.slane %v1297_v41, 1  ;;  %v1300_v5 = vrot.slane %v1297_v41, 2  ;;  %v1301_v51 = vrot.slane %v1297_v41, 3  ;;  %v1302_v53 = vperm.slane %v1297_v41, 0 }
 0x478   : > { %v1303_v61 = vperm.slane %v1299_v50, 0  ;;  %v1304_v20 = vperm.slane %v1300_v5, 0  ;;  %v1305_v21 = vperm.slane %v1301_v51, 0  ;;  %v1310_v10 = vmul.f32 %v1302_v53, %v2376_v63 }
 0x479   : > { %v1311_v49 = vmul.f32 %v1302_v53, %v2378_v3 }
 0x47a   : > { %v1312_v12 = vmul.f32 %v1303_v61, %v2380_v9  ;;  %v1313_v16 = vmul.f32 %v1303_v61, %v2382_v11  ;;  %v1314_v6 = vmul.f32 %v1304_v20, %v2384_v18  ;;  %v1315_v22 = vmul.f32 %v1304_v20, %v2386_v15 }
 0x47b   : > { %v1316_v23 = vmul.f32 %v1305_v21, %v2388_v52  ;;  %v1317_v24 = vmul.f32 %v1305_v21, %v2390_v17  ;;  %v1321_v25 = vadd.f32 %v1626_v55, %v1310_v10  ;;  %v1322_v63 = vadd.f32 %v1626_v55, %v1311_v49  ;;  %v1634_v17 = vld [vmem:[%s2024_s5 + $0x18] sm:$0xff]  ;;  %s1375_s5 = sshll.u32 %s430_s17, 4  ;;  %s1376_s5 = int_to_ptr.vmem [resolvable:$true] %s1375_s5 }
 0x47c   : > { %v1323_v19 = vadd.f32 %v1626_v55, %v1312_v12  ;;  %v1324_v3 = vadd.f32 %v1626_v55, %v1313_v16  ;;  %v1325_v9 = vadd.f32 %v1626_v55, %v1314_v6  ;;  %v1326_v26 = vadd.f32 %v1626_v55, %v1315_v22 }
 0x47d   : > { %v1327_v11 = vadd.f32 %v1626_v55, %v1316_v23  ;;  %v1328_v18 = vadd.f32 %v1626_v55, %v1317_v24  ;;  %v1329_v15 = vadd.f32 %v1631_v27, %v1321_v25  ;;  %v1330_v52 = vadd.f32 %v1632_v28, %v1322_v63 }
 0x47e   : > { %v1331_v30 = vadd.f32 %v1633_v29, %v1323_v19  ;;  %v1332_v31 = vadd.f32 %v1634_v17, %v1324_v3  ;;  %v1333_v8 = vadd.f32 %v1635_v32, %v1325_v9  ;;  %v1334_v34 = vadd.f32 %v1636_v33, %v1326_v26 }
 0x47f   : > { %v1335_v40 = vadd.f32 %v1637_v37, %v1327_v11  ;;  %v1336_v45 = vadd.f32 %v1638_v42, %v1328_v18  ;;  %v1337_v48 = vmul.f32 0.01, %v1329_v15  ;;  %v1338_v54 = vmul.f32 0.01, %v1330_v52 }
 0x480   : > { %v1339_v56 = vmul.f32 0.01, %v1331_v30  ;;  %v1340_v57 = vmul.f32 0.01, %v1332_v31  ;;  %v1341_v58 = vmul.f32 0.01, %v1333_v8 }
 0x481   : > { %v1342_v59 = vmul.f32 0.01, %v1334_v34  ;;  %v1343_v0 = vmul.f32 0.01, %v1335_v40  ;;  %v1345_v2 = vmax.f32 %v1329_v15, %v1337_v48  ;;  %v1344_v7 = vmul.f32 0.01, %v1336_v45 }
 0x482   : > { %v1346_v14 = vmax.f32 %v1330_v52, %v1338_v54  ;;  %v1347_v35 = vmax.f32 %v1331_v30, %v1339_v56  ;;  %v1348_v36 = vmax.f32 %v1332_v31, %v1340_v57  ;;  %v1349_v38 = vmax.f32 %v1333_v8, %v1341_v58 }
 0x483   : > { %1353 = vst [vmem:[%s430_s17] sm:$0xff] %v1345_v2  ;;  %v1350_v39 = vmax.f32 %v1334_v34, %v1342_v59  ;;  %v1351_v43 = vmax.f32 %v1335_v40, %v1343_v0  ;;  %v1352_v44 = vmax.f32 %v1336_v45, %v1344_v7 }
 0x484   : > { %1354 = vst [vmem:[%s430_s17 + $0x8] sm:$0xff] %v1346_v14 }
 0x485   : > { %1355 = vst [vmem:[%s430_s17 + $0x10] sm:$0xff] %v1347_v35 }
 0x486   : > { %1356 = vst [vmem:[%s430_s17 + $0x18] sm:$0xff] %v1348_v36 }
 0x487   : > { %1357 = vst [vmem:[%s430_s17 + $0x20] sm:$0xff] %v1349_v38 }
 0x488   : > { %1358 = vst [vmem:[%s430_s17 + $0x28] sm:$0xff] %v1350_v39 }
 0x489   : > { %1359 = vst [vmem:[%s430_s17 + $0x30] sm:$0xff] %v1351_v43 }
 0x48a   : > { %1360 = vst [vmem:[%s430_s17 + $0x38] sm:$0xff] %v1352_v44 }
 0x48b   : > { %1786 = shalt.err (!%p1783_p10)
}
 0x48c   : > { %s1840_s1 = smov 128   ;;  %s1841_s19 = smov 8  }
 0x48d   : > { %1554 = dma.vmem_to_hbm [thread:$0]  (%p1988_p3), %s1376_s5, 1024, %s1378_s26, %s1362_s22, %s1840_s1, %s1840_s1, %s1841_s19  }
 0x48e PF: > { %s1392_s24 = sand.u32 1, %s1821_s13   ;;  %p2496_p12 = scmp.ge.s32.totalorder %s1833_s16, 2 }
 0x48f   : > { %s1393_s11 = scalar_lea.sflag [#allocation4], %s1392_s24 }
 0x490   : > { %p1571_p13 = pnand %p2496_p12, %p1932_p6 }
 0x492   : > { %p1572_p0 = pneg %p1571_p13 }
 0x494   : > { %1816 = dma.done.wait (%p1572_p0), %s1393_s11, 1024  }
 0x495   : > { %1818 = vsyncadd (%p1572_p0), %s1393_s11, 4294966272  ;;  %s2497_s12 = sld [smem:[#allocation15_spill]]  ;;  %p25_p5 = scmp.ge.s32.totalorder %s1970_s29, 4  }
 0x496   : > { %s2498_s13 = smov %s1825_s14  ;;  %s2499_s14 = smov %s1829_s15 }
 0x497   : > { %s2501_s16 = smov %s1970_s29  ;;  %27 = sbr.rel (!%p25_p5) target bundleno = 11 (0xb), region = 117 }
 0x49b   : > { %s2500_s15 = smov %s2497_s12 }
 0x49c   :  { %1399 = vsyncpa [#allocation3], 1 }
 0x49d   :  { %1401 = vsyncpa [#allocation3 + $0x1], 1 }
 0x49e   :  { %1402 = vsyncpa [#allocation6], 1 }
 0x49f   :  { %1403 = vsyncpa [#allocation9], 1 }
 0x4a0   :  { %1404 = vsyncpa [#allocation4], 1 }
 0x4a1   :  { %1406 = vsyncpa [#allocation4 + $0x1], 1 }

</bundles_post_ra>
